<compile_context>
chip_gen: v7x
topology: tpu7x:2x2x1
jax: 0.10.0
libtpu: 0.0.40
codegen_flags: <defaults>
</compile_context>

<pallas_src>
import functools
import math

import jax
import jax.numpy as jnp
from jax import lax
from jax.experimental import pallas as pl
from jax.experimental.pallas import tpu as pltpu

# Constants from _TVDenoiser.__init__ (no learned parameters in the module).
TAU = 0.01
RHO = 1.99
SIGMA = 1.0 / TAU / 8.0          # 12.5, exactly representable
C0 = 1.0 / (1.0 + TAU)           # 1/(1+tau)


def _choose_blocking(n, h, w):
    """Pick images-per-block (bn), padded image count and number of grid blocks
    for the packed (H, N*W) layout.

    Guarantees bn*w is a multiple of 128 (lane-dense stores).  Targets ~512
    lanes per block (amortizes loop/scalar and grid-step overhead), caps the
    per-buffer footprint at ~1 MiB and the lane width at 2048 (v7x-safe VMEM
    budget), and prefers >= 2 blocks when there are >= 2 lane-dense groups of
    real work so v7x megacore sharding has something to split."""
    q = 128 // math.gcd(w, 128)          # min images per lane-dense block
    gw = q * w                           # lanes per group (multiple of 128)
    n_groups = max(1, -(-n // q))        # groups of (padded) images
    # Hard caps on groups-per-block (always >= 1 even if one group overshoots).
    cap = max(1, min(2048 // gw if gw <= 2048 else 1,
                     max(1, (1024 * 1024) // (h * gw * 4))))
    # Keep >= 2 blocks when there are >= 2 groups of real work (v7x megacore).
    if n_groups >= 2:
        cap = min(cap, -(-n_groups // 2))
    # Grow toward ~512 lanes per block.
    gpb = min(cap, n_groups, max(1, -(-512 // gw)))
    bn = gpb * q
    num_blocks = -(-n_groups // gpb)
    n_pad = num_blocks * bn
    return bn, n_pad, num_blocks


def _tv_kernel(lam_ref, y_ref, out_ref, u0_ref, u1_ref, msr_ref, msc_ref,
               *, w, n_outer, check_every, crit):
    h, bw = out_ref.shape                      # packed block: (H, block_n * W)
    lam = lam_ref[0]                           # lambda (ths), scalar from SMEM

    # ---- one-time per-block setup (hoisted out of the iteration loop) -------
    # Forward-difference validity masks with sigma folded in, kept in VMEM so
    # they don't pin vregs across the whole while loop.
    row = lax.broadcasted_iota(jnp.int32, (h, bw), 0)
    col = lax.broadcasted_iota(jnp.int32, (h, bw), 1)
    msr_ref[...] = jnp.where(row < h - 1, SIGMA, 0.0).astype(jnp.float32)
    msc_ref[...] = jnp.where((col % w) < w - 1, SIGMA, 0.0).astype(jnp.float32)

    out_ref[...] = y_ref[...]                  # x2 = y.clone()
    u0_ref[...] = jnp.zeros_like(u0_ref)       # u2 = 0 (H-difference plane)
    u1_ref[...] = jnp.zeros_like(u1_ref)       # u2 = 0 (W-difference plane)

    crit2 = jnp.float32(crit * crit)
    one_m_rho = jnp.float32(1.0 - RHO)

    def outer(carry):
        it, _ = carry
        # Load state once per outer step; the check_every inner iterations run
        # as a straight-line unrolled region on register-carried values.
        x2 = out_ref[...]
        u0 = u0_ref[...]
        u1 = u1_ref[...]
        yc = (TAU * C0) * y_ref[...]           # tau/(1+tau) * y
        msr = msr_ref[...]
        msc = msc_ref[...]

        x_prev = x2
        for _ in range(check_every):           # fully unrolled (static count)
            x_prev = x2
            # nabla_adjoint(u2): backward differences.  No boundary masks
            # needed: u0's last row and u1's per-image last column are exactly
            # zero (kept so by the masked forward differences below), so the
            # circularly wrapped entries of the rolls are already zero.
            adj = ((pltpu.roll(u0, 1, axis=0) - u0)
                   + (pltpu.roll(u1, 1, axis=1) - u1))
            # x = prox_tau_fx(x2 - tau*adj, y) = (x2 - tau*adj)/(1+tau) + yc
            x = (x2 - TAU * adj) * C0 + yc
            # u = prox_sigma_g_conj(u2 + sigma*nabla(2x - x2), lambda)
            z = 2.0 * x - x2
            # forward differences (roll by size-1 == roll by -1), masked and
            # pre-scaled by sigma via msr/msc.
            v0 = u0 + (pltpu.roll(z, h - 1, axis=0) - z) * msr
            v1 = u1 + (pltpu.roll(z, bw - 1, axis=1) - z) * msc
            # scale = min(lam/|v|, 1); exact rsqrt; rsqrt(0)=inf -> scale=1 -> 0
            rs = RHO * jnp.minimum(lam * lax.rsqrt(v0 * v0 + v1 * v1), 1.0)
            # over-relaxed updates
            x2 = x2 + RHO * (x - x2)
            u0 = one_m_rho * u0 + rs * v0
            u1 = one_m_rho * u1 + rs * v1

        out_ref[...] = x2
        u0_ref[...] = u0
        u1_ref[...] = u1

        # Convergence (once per outer step): ||x_prev - x2|| / ||x2 + 1e-12|| <
        # crit, rewritten sqrt- and divide-free as a single fused reduction.
        d = x_prev - x2
        e = x2 + 1e-12
        done = jnp.sum(d * d - crit2 * (e * e)) < 0.0
        return it + 1, done

    def cond(carry):
        it, done = carry
        return jnp.logical_and(it < n_outer, jnp.logical_not(done))

    # Genuine early exit (the torch loop `break`s): stop iterating once converged.
    lax.while_loop(cond, outer, (jnp.int32(0), jnp.array(False)))


def tv_denoise(y, ths, n_it_max=1000, crit=1e-5, check_every=8):
    """Pallas TV denoiser. y: (B, C, H, W) float32 (NCHW), ths: scalar lambda."""
    b, c, h, w = y.shape
    n = b * c
    bn, n_pad, num_blocks = _choose_blocking(n, h, w)
    bw = bn * w

    yf = y.reshape(n, h, w).astype(jnp.float32)
    if n_pad != n:
        # Zero padding images: they stay exactly zero under TV and converge at
        # the first check, so they only pad the lane axis to a 128 multiple.
        yf = jnp.concatenate([yf, jnp.zeros((n_pad - n, h, w), jnp.float32)], 0)
    # (N,H,W) -> (H,N,W) -> (H, N*W): H on sublanes, packed images along lanes.
    y_packed = jnp.transpose(yf, (1, 0, 2)).reshape(h, n_pad * w)

    # lam=0 would give 0*inf=NaN in the prox; clamp (lambda->0+ limit == identity).
    lam = jnp.full((1,), max(float(ths), 1e-30), jnp.float32)

    n_outer = max(1, n_it_max // check_every)
    kernel = functools.partial(_tv_kernel, w=w, n_outer=n_outer,
                               check_every=check_every, crit=float(crit))

    block_bytes = h * bw * 4
    vmem_limit = int(min(100 * 2 ** 20, max(16 * 2 ** 20, 28 * block_bytes)))

    out_packed = pl.pallas_call(
        kernel,
        out_shape=jax.ShapeDtypeStruct((h, n_pad * w), jnp.float32),
        grid_spec=pltpu.PrefetchScalarGridSpec(
            num_scalar_prefetch=1,                         # lambda -> SMEM
            grid=(num_blocks,),
            in_specs=[pl.BlockSpec((h, bw), lambda i, lam_ref: (0, i))],
            out_specs=pl.BlockSpec((h, bw), lambda i, lam_ref: (0, i)),
            scratch_shapes=[
                pltpu.VMEM((h, bw), jnp.float32),   # u0 (dual, H-direction)
                pltpu.VMEM((h, bw), jnp.float32),   # u1 (dual, W-direction)
                pltpu.VMEM((h, bw), jnp.float32),   # sigma * (valid H-diff) mask
                pltpu.VMEM((h, bw), jnp.float32),   # sigma * (valid W-diff) mask
            ],
        ),
        compiler_params=pltpu.CompilerParams(
            dimension_semantics=("parallel",),
            vmem_limit_bytes=vmem_limit,
        ),
    )(lam, y_packed)

    out = out_packed.reshape(h, n_pad, w).transpose(1, 0, 2)[:n]
    return out.reshape(b, c, h, w)


def tv_denoise_ref(y, ths, n_it_max=1000, crit=1e-5, check_every=8):
    """Pure-JAX reference with the same semantics as the kernel (same block
    grouping / padding, same check-every-`check_every` per-block convergence
    test, same update formulas)."""
    b, c, h, w = y.shape
    n = b * c
    bn, n_pad, num_blocks = _choose_blocking(n, h, w)
    yf = y.reshape(n, h, w).astype(jnp.float32)
    if n_pad != n:
        yf = jnp.concatenate([yf, jnp.zeros((n_pad - n, h, w), jnp.float32)], 0)
    yb = yf.reshape(num_blocks, bn, h, w)

    lam = max(float(ths), 1e-30)
    n_outer = max(1, n_it_max // check_every)
    crit2 = jnp.float32(crit * crit)
    one_m_rho = jnp.float32(1.0 - RHO)

    def nabla(z):
        g0 = jnp.pad(z[:, 1:, :] - z[:, :-1, :], ((0, 0), (0, 1), (0, 0)))
        g1 = jnp.pad(z[:, :, 1:] - z[:, :, :-1], ((0, 0), (0, 0), (0, 1)))
        return g0, g1

    def nabla_adj(u0, u1):
        a0 = (jnp.pad(u0[:, :-1, :], ((0, 0), (1, 0), (0, 0)))
              - jnp.pad(u0[:, :-1, :], ((0, 0), (0, 1), (0, 0))))
        a1 = (jnp.pad(u1[:, :, :-1], ((0, 0), (0, 0), (1, 0)))
              - jnp.pad(u1[:, :, :-1], ((0, 0), (0, 0), (0, 1))))
        return a0 + a1

    def solve(y1):                            # one block of bn images
        yc = (TAU * C0) * y1

        def outer(_, carry):
            x2, u0, u1, done = carry
            x2s, u0s, u1s = x2, u0, u1        # freeze point if already done
            x_prev = x2
            for _ in range(check_every):
                x_prev = x2
                x = (x2 - TAU * nabla_adj(u0, u1)) * C0 + yc
                g0, g1 = nabla(2.0 * x - x2)
                v0 = u0 + SIGMA * g0
                v1 = u1 + SIGMA * g1
                rs = RHO * jnp.minimum(lam * lax.rsqrt(v0 * v0 + v1 * v1), 1.0)
                x2 = x2 + RHO * (x - x2)
                u0 = one_m_rho * u0 + rs * v0
                u1 = one_m_rho * u1 + rs * v1
            d = x_prev - x2
            e = x2 + 1e-12
            new_done = jnp.sum(d * d - crit2 * (e * e)) < 0.0
            live = jnp.logical_not(done)
            x2 = jnp.where(live, x2, x2s)
            u0 = jnp.where(live, u0, u0s)
            u1 = jnp.where(live, u1, u1s)
            return x2, u0, u1, jnp.logical_or(done, jnp.logical_and(live, new_done))

        x2, _, _, _ = lax.fori_loop(
            0, n_outer, outer,
            (y1, jnp.zeros_like(y1), jnp.zeros_like(y1), jnp.array(False)))
        return x2

    out = jax.vmap(solve)(yb)
    return out.reshape(n_pad, h, w)[:n].reshape(b, c, h, w)


if __name__ == "__main__":
    key = jax.random.PRNGKey(0)
    B, C, H, W = 2, 4, 16, 16
    y = jax.random.normal(key, (B, C, H, W), dtype=jnp.float32)
    ths = 0.1

    out = jax.block_until_ready(tv_denoise(y, ths, n_it_max=1000, crit=1e-5))
    ref = jax.block_until_ready(tv_denoise_ref(y, ths, n_it_max=1000, crit=1e-5))

    assert out.shape == (B, C, H, W) and out.dtype == jnp.float32
    max_err = float(jnp.max(jnp.abs(out - ref)))
    assert max_err < 1e-3, f"kernel vs reference mismatch: {max_err}"

    print("KERNEL_OK")
</pallas_src>

<mosaic_0001>
module attributes {stable_mosaic.version = 11 : i64} {
  func.func @_tv_kernel(%arg0: i32, %arg1: memref<1xf32, #tpu.memory_space<smem>>, %arg2: memref<16x128xf32, #tpu.memory_space<vmem>>, %arg3: memref<16x128xf32, #tpu.memory_space<vmem>>, %arg4: memref<16x128xf32, #tpu.memory_space<vmem>>, %arg5: memref<16x128xf32, #tpu.memory_space<vmem>>, %arg6: memref<16x128xf32, #tpu.memory_space<vmem>>, %arg7: memref<16x128xf32, #tpu.memory_space<vmem>>) attributes {dimension_semantics = [#tpu.dimension_semantics<parallel>], iteration_bounds = array<i64: 1>, scalar_prefetch = 1 : i64, scratch_operands = 4 : i64, tpu.core_type = #tpu.core_type<tc>, window_params = [{transform_indices = @transform_0, window_bounds = array<i64: 16, 128>}, {transform_indices = @transform_1, window_bounds = array<i64: 16, 128>}]} {
    %c0 = arith.constant 0 : index
    %0 = memref.load %arg1[%c0] : memref<1xf32, #tpu.memory_space<smem>>
    %1 = tpu.iota {dimensions = array<i32: 0>} : vector<16x128xi32>
    %2 = tpu.iota {dimensions = array<i32: 1>} : vector<16x128xi32>
    %c15_i32 = arith.constant 15 : i32
    %3 = vector.broadcast %c15_i32 : i32 to vector<16x128xi32>
    %4 = arith.cmpi slt, %1, %3 : vector<16x128xi32>
    %cst = arith.constant 1.250000e+01 : f32
    %cst_0 = arith.constant 0.000000e+00 : f32
    %5 = vector.broadcast %cst : f32 to vector<16x128xf32>
    %6 = vector.broadcast %cst_0 : f32 to vector<16x128xf32>
    %7 = arith.select %4, %5, %6 : vector<16x128xi1>, vector<16x128xf32>
    %c0_1 = arith.constant 0 : index
    %c0_2 = arith.constant 0 : index
    %8 = vector.load %arg6[%c0_1, %c0_2] : memref<16x128xf32, #tpu.memory_space<vmem>>, vector<16x128xf32>
    tpu.vector_store %arg6[%c0_1, %c0_2], %7 {strides = array<i32>} : memref<16x128xf32, #tpu.memory_space<vmem>>, vector<16x128xf32>,
    %c16_i32 = arith.constant 16 : i32
    %c0_i32 = arith.constant 0 : i32
    %9 = arith.cmpi eq, %c16_i32, %c0_i32 : i32
    %c1_i32 = arith.constant 1 : i32
    %10 = arith.select %9, %c1_i32, %c16_i32 : i32
    %11 = vector.broadcast %10 : i32 to vector<16x128xi32>
    %12 = arith.remsi %2, %11 : vector<16x128xi32>
    %c0_i32_3 = arith.constant 0 : i32
    %13 = vector.broadcast %c0_i32_3 : i32 to vector<16x128xi32>
    %14 = arith.cmpi ne, %12, %13 : vector<16x128xi32>
    %c0_i32_4 = arith.constant 0 : i32
    %15 = vector.broadcast %c0_i32_4 : i32 to vector<16x128xi32>
    %16 = arith.cmpi slt, %12, %15 : vector<16x128xi32>
    %c0_i32_5 = arith.constant 0 : i32
    %17 = arith.cmpi slt, %10, %c0_i32_5 : i32
    %18 = vector.broadcast %17 : i1 to vector<16x128xi1>
    %19 = vector.broadcast %18 : vector<16x128xi1> to vector<16x128xi1>
    %20 = arith.xori %16, %19 : vector<16x128xi1>
    %21 = arith.andi %20, %14 : vector<16x128xi1>
    %22 = vector.broadcast %10 : i32 to vector<16x128xi32>
    %23 = arith.addi %12, %22 : vector<16x128xi32>
    %24 = arith.select %21, %23, %12 : vector<16x128xi1>, vector<16x128xi32>
    %c15_i32_6 = arith.constant 15 : i32
    %25 = vector.broadcast %c15_i32_6 : i32 to vector<16x128xi32>
    %26 = arith.cmpi slt, %24, %25 : vector<16x128xi32>
    %cst_7 = arith.constant 1.250000e+01 : f32
    %cst_8 = arith.constant 0.000000e+00 : f32
    %27 = vector.broadcast %cst_7 : f32 to vector<16x128xf32>
    %28 = vector.broadcast %cst_8 : f32 to vector<16x128xf32>
    %29 = arith.select %26, %27, %28 : vector<16x128xi1>, vector<16x128xf32>
    %c0_9 = arith.constant 0 : index
    %c0_10 = arith.constant 0 : index
    %30 = vector.load %arg7[%c0_9, %c0_10] : memref<16x128xf32, #tpu.memory_space<vmem>>, vector<16x128xf32>
    tpu.vector_store %arg7[%c0_9, %c0_10], %29 {strides = array<i32>} : memref<16x128xf32, #tpu.memory_space<vmem>>, vector<16x128xf32>,
    %c0_11 = arith.constant 0 : index
    %c0_12 = arith.constant 0 : index
    %31 = vector.load %arg2[%c0_11, %c0_12] : memref<16x128xf32, #tpu.memory_space<vmem>>, vector<16x128xf32>
    %c0_13 = arith.constant 0 : index
    %c0_14 = arith.constant 0 : index
    %32 = vector.load %arg3[%c0_13, %c0_14] : memref<16x128xf32, #tpu.memory_space<vmem>>, vector<16x128xf32>
    tpu.vector_store %arg3[%c0_13, %c0_14], %31 {strides = array<i32>} : memref<16x128xf32, #tpu.memory_space<vmem>>, vector<16x128xf32>,
    %cst_15 = arith.constant 0.000000e+00 : f32
    %33 = vector.broadcast %cst_15 : f32 to vector<16x128xf32>
    %c0_16 = arith.constant 0 : index
    %c0_17 = arith.constant 0 : index
    %34 = vector.load %arg4[%c0_16, %c0_17] : memref<16x128xf32, #tpu.memory_space<vmem>>, vector<16x128xf32>
    tpu.vector_store %arg4[%c0_16, %c0_17], %33 {strides = array<i32>} : memref<16x128xf32, #tpu.memory_space<vmem>>, vector<16x128xf32>,
    %cst_18 = arith.constant 0.000000e+00 : f32
    %35 = vector.broadcast %cst_18 : f32 to vector<16x128xf32>
    %c0_19 = arith.constant 0 : index
    %c0_20 = arith.constant 0 : index
    %36 = vector.load %arg5[%c0_19, %c0_20] : memref<16x128xf32, #tpu.memory_space<vmem>>, vector<16x128xf32>
    tpu.vector_store %arg5[%c0_19, %c0_20], %35 {strides = array<i32>} : memref<16x128xf32, #tpu.memory_space<vmem>>, vector<16x128xf32>,
    %cst_21 = arith.constant -9.900000e-01 : f32
    %cst_22 = arith.constant 1.000000e-10 : f32
    %c0_i32_23 = arith.constant 0 : i32
    %false = arith.constant false
    %37:2 = scf.while (%arg8 = %c0_i32_23, %arg9 = %false) : (i32, i1) -> (i32, i1) {
      %c125_i32 = arith.constant 125 : i32
      %38 = arith.cmpi slt, %arg8, %c125_i32 : i32
      %true = arith.constant true
      %39 = arith.xori %arg9, %true : i1
      %40 = arith.andi %38, %39 : i1
      scf.condition(%40) %arg8, %arg9 : i32, i1
    } do {
    ^bb0(%arg8: i32, %arg9: i1):
      %c0_24 = arith.constant 0 : index
      %c0_25 = arith.constant 0 : index
      %38 = vector.load %arg3[%c0_24, %c0_25] : memref<16x128xf32, #tpu.memory_space<vmem>>, vector<16x128xf32>
      %c0_26 = arith.constant 0 : index
      %c0_27 = arith.constant 0 : index
      %39 = vector.load %arg4[%c0_26, %c0_27] : memref<16x128xf32, #tpu.memory_space<vmem>>, vector<16x128xf32>
      %c0_28 = arith.constant 0 : index
      %c0_29 = arith.constant 0 : index
      %40 = vector.load %arg5[%c0_28, %c0_29] : memref<16x128xf32, #tpu.memory_space<vmem>>, vector<16x128xf32>
      %c0_30 = arith.constant 0 : index
      %c0_31 = arith.constant 0 : index
      %41 = vector.load %arg2[%c0_30, %c0_31] : memref<16x128xf32, #tpu.memory_space<vmem>>, vector<16x128xf32>
      %cst_32 = arith.constant 9.900990e-03 : f32
      %42 = vector.broadcast %cst_32 : f32 to vector<16x128xf32>
      %43 = arith.mulf %42, %41 : vector<16x128xf32>
      %c0_33 = arith.constant 0 : index
      %c0_34 = arith.constant 0 : index
      %44 = vector.load %arg6[%c0_33, %c0_34] : memref<16x128xf32, #tpu.memory_space<vmem>>, vector<16x128xf32>
      %c0_35 = arith.constant 0 : index
      %c0_36 = arith.constant 0 : index
      %45 = vector.load %arg7[%c0_35, %c0_36] : memref<16x128xf32, #tpu.memory_space<vmem>>, vector<16x128xf32>
      %c1_i32_37 = arith.constant 1 : i32
      %46 = tpu.dynamic_rotate %39 by %c1_i32_37 dim 0 : vector<16x128xf32>, i32 -> vector<16x128xf32>
      %47 = arith.subf %46, %39 : vector<16x128xf32>
      %c1_i32_38 = arith.constant 1 : i32
      %48 = tpu.dynamic_rotate %40 by %c1_i32_38 dim 1 : vector<16x128xf32>, i32 -> vector<16x128xf32>
      %49 = arith.subf %48, %40 : vector<16x128xf32>
      %50 = arith.addf %47, %49 : vector<16x128xf32>
      %cst_39 = arith.constant 0.00999999977 : f32
      %51 = vector.broadcast %cst_39 : f32 to vector<16x128xf32>
      %52 = arith.mulf %51, %50 : vector<16x128xf32>
      %53 = arith.subf %38, %52 : vector<16x128xf32>
      %cst_40 = arith.constant 9.900990e-01 : f32
      %54 = vector.broadcast %cst_40 : f32 to vector<16x128xf32>
      %55 = arith.mulf %53, %54 : vector<16x128xf32>
      %56 = arith.addf %55, %43 : vector<16x128xf32>
      %cst_41 = arith.constant 2.000000e+00 : f32
      %57 = vector.broadcast %cst_41 : f32 to vector<16x128xf32>
      %58 = arith.mulf %57, %56 : vector<16x128xf32>
      %59 = arith.subf %58, %38 : vector<16x128xf32>
      %c15_i32_42 = arith.constant 15 : i32
      %60 = tpu.dynamic_rotate %59 by %c15_i32_42 dim 0 : vector<16x128xf32>, i32 -> vector<16x128xf32>
      %61 = arith.subf %60, %59 : vector<16x128xf32>
      %62 = arith.mulf %61, %44 : vector<16x128xf32>
      %63 = arith.addf %39, %62 : vector<16x128xf32>
      %c127_i32 = arith.constant 127 : i32
      %64 = tpu.dynamic_rotate %59 by %c127_i32 dim 1 : vector<16x128xf32>, i32 -> vector<16x128xf32>
      %65 = arith.subf %64, %59 : vector<16x128xf32>
      %66 = arith.mulf %65, %45 : vector<16x128xf32>
      %67 = arith.addf %40, %66 : vector<16x128xf32>
      %68 = arith.mulf %63, %63 : vector<16x128xf32>
      %69 = arith.mulf %67, %67 : vector<16x128xf32>
      %70 = arith.addf %68, %69 : vector<16x128xf32>
      %71 = math.rsqrt %70 : vector<16x128xf32>
      %72 = vector.broadcast %0 : f32 to vector<16x128xf32>
      %73 = arith.mulf %72, %71 : vector<16x128xf32>
      %cst_43 = arith.constant 1.000000e+00 : f32
      %74 = vector.broadcast %cst_43 : f32 to vector<16x128xf32>
      %75 = arith.minimumf %73, %74 : vector<16x128xf32>
      %cst_44 = arith.constant 1.990000e+00 : f32
      %76 = vector.broadcast %cst_44 : f32 to vector<16x128xf32>
      %77 = arith.mulf %76, %75 : vector<16x128xf32>
      %78 = arith.subf %56, %38 : vector<16x128xf32>
      %cst_45 = arith.constant 1.990000e+00 : f32
      %79 = vector.broadcast %cst_45 : f32 to vector<16x128xf32>
      %80 = arith.mulf %79, %78 : vector<16x128xf32>
      %81 = arith.addf %38, %80 : vector<16x128xf32>
      %82 = vector.broadcast %cst_21 : f32 to vector<16x128xf32>
      %83 = arith.mulf %82, %39 : vector<16x128xf32>
      %84 = arith.mulf %77, %63 : vector<16x128xf32>
      %85 = arith.addf %83, %84 : vector<16x128xf32>
      %86 = vector.broadcast %cst_21 : f32 to vector<16x128xf32>
      %87 = arith.mulf %86, %40 : vector<16x128xf32>
      %88 = arith.mulf %77, %67 : vector<16x128xf32>
      %89 = arith.addf %87, %88 : vector<16x128xf32>
      %c1_i32_46 = arith.constant 1 : i32
      %90 = tpu.dynamic_rotate %85 by %c1_i32_46 dim 0 : vector<16x128xf32>, i32 -> vector<16x128xf32>
      %91 = arith.subf %90, %85 : vector<16x128xf32>
      %c1_i32_47 = arith.constant 1 : i32
      %92 = tpu.dynamic_rotate %89 by %c1_i32_47 dim 1 : vector<16x128xf32>, i32 -> vector<16x128xf32>
      %93 = arith.subf %92, %89 : vector<16x128xf32>
      %94 = arith.addf %91, %93 : vector<16x128xf32>
      %cst_48 = arith.constant 0.00999999977 : f32
      %95 = vector.broadcast %cst_48 : f32 to vector<16x128xf32>
      %96 = arith.mulf %95, %94 : vector<16x128xf32>
      %97 = arith.subf %81, %96 : vector<16x128xf32>
      %cst_49 = arith.constant 9.900990e-01 : f32
      %98 = vector.broadcast %cst_49 : f32 to vector<16x128xf32>
      %99 = arith.mulf %97, %98 : vector<16x128xf32>
      %100 = arith.addf %99, %43 : vector<16x128xf32>
      %cst_50 = arith.constant 2.000000e+00 : f32
      %101 = vector.broadcast %cst_50 : f32 to vector<16x128xf32>
      %102 = arith.mulf %101, %100 : vector<16x128xf32>
      %103 = arith.subf %102, %81 : vector<16x128xf32>
      %c15_i32_51 = arith.constant 15 : i32
      %104 = tpu.dynamic_rotate %103 by %c15_i32_51 dim 0 : vector<16x128xf32>, i32 -> vector<16x128xf32>
      %105 = arith.subf %104, %103 : vector<16x128xf32>
      %106 = arith.mulf %105, %44 : vector<16x128xf32>
      %107 = arith.addf %85, %106 : vector<16x128xf32>
      %c127_i32_52 = arith.constant 127 : i32
      %108 = tpu.dynamic_rotate %103 by %c127_i32_52 dim 1 : vector<16x128xf32>, i32 -> vector<16x128xf32>
      %109 = arith.subf %108, %103 : vector<16x128xf32>
      %110 = arith.mulf %109, %45 : vector<16x128xf32>
      %111 = arith.addf %89, %110 : vector<16x128xf32>
      %112 = arith.mulf %107, %107 : vector<16x128xf32>
      %113 = arith.mulf %111, %111 : vector<16x128xf32>
      %114 = arith.addf %112, %113 : vector<16x128xf32>
      %115 = math.rsqrt %114 : vector<16x128xf32>
      %116 = vector.broadcast %0 : f32 to vector<16x128xf32>
      %117 = arith.mulf %116, %115 : vector<16x128xf32>
      %cst_53 = arith.constant 1.000000e+00 : f32
      %118 = vector.broadcast %cst_53 : f32 to vector<16x128xf32>
      %119 = arith.minimumf %117, %118 : vector<16x128xf32>
      %cst_54 = arith.constant 1.990000e+00 : f32
      %120 = vector.broadcast %cst_54 : f32 to vector<16x128xf32>
      %121 = arith.mulf %120, %119 : vector<16x128xf32>
      %122 = arith.subf %100, %81 : vector<16x128xf32>
      %cst_55 = arith.constant 1.990000e+00 : f32
      %123 = vector.broadcast %cst_55 : f32 to vector<16x128xf32>
      %124 = arith.mulf %123, %122 : vector<16x128xf32>
      %125 = arith.addf %81, %124 : vector<16x128xf32>
      %126 = vector.broadcast %cst_21 : f32 to vector<16x128xf32>
      %127 = arith.mulf %126, %85 : vector<16x128xf32>
      %128 = arith.mulf %121, %107 : vector<16x128xf32>
      %129 = arith.addf %127, %128 : vector<16x128xf32>
      %130 = vector.broadcast %cst_21 : f32 to vector<16x128xf32>
      %131 = arith.mulf %130, %89 : vector<16x128xf32>
      %132 = arith.mulf %121, %111 : vector<16x128xf32>
      %133 = arith.addf %131, %132 : vector<16x128xf32>
      %c1_i32_56 = arith.constant 1 : i32
      %134 = tpu.dynamic_rotate %129 by %c1_i32_56 dim 0 : vector<16x128xf32>, i32 -> vector<16x128xf32>
      %135 = arith.subf %134, %129 : vector<16x128xf32>
      %c1_i32_57 = arith.constant 1 : i32
      %136 = tpu.dynamic_rotate %133 by %c1_i32_57 dim 1 : vector<16x128xf32>, i32 -> vector<16x128xf32>
      %137 = arith.subf %136, %133 : vector<16x128xf32>
      %138 = arith.addf %135, %137 : vector<16x128xf32>
      %cst_58 = arith.constant 0.00999999977 : f32
      %139 = vector.broadcast %cst_58 : f32 to vector<16x128xf32>
      %140 = arith.mulf %139, %138 : vector<16x128xf32>
      %141 = arith.subf %125, %140 : vector<16x128xf32>
      %cst_59 = arith.constant 9.900990e-01 : f32
      %142 = vector.broadcast %cst_59 : f32 to vector<16x128xf32>
      %143 = arith.mulf %141, %142 : vector<16x128xf32>
      %144 = arith.addf %143, %43 : vector<16x128xf32>
      %cst_60 = arith.constant 2.000000e+00 : f32
      %145 = vector.broadcast %cst_60 : f32 to vector<16x128xf32>
      %146 = arith.mulf %145, %144 : vector<16x128xf32>
      %147 = arith.subf %146, %125 : vector<16x128xf32>
      %c15_i32_61 = arith.constant 15 : i32
      %148 = tpu.dynamic_rotate %147 by %c15_i32_61 dim 0 : vector<16x128xf32>, i32 -> vector<16x128xf32>
      %149 = arith.subf %148, %147 : vector<16x128xf32>
      %150 = arith.mulf %149, %44 : vector<16x128xf32>
      %151 = arith.addf %129, %150 : vector<16x128xf32>
      %c127_i32_62 = arith.constant 127 : i32
      %152 = tpu.dynamic_rotate %147 by %c127_i32_62 dim 1 : vector<16x128xf32>, i32 -> vector<16x128xf32>
      %153 = arith.subf %152, %147 : vector<16x128xf32>
      %154 = arith.mulf %153, %45 : vector<16x128xf32>
      %155 = arith.addf %133, %154 : vector<16x128xf32>
      %156 = arith.mulf %151, %151 : vector<16x128xf32>
      %157 = arith.mulf %155, %155 : vector<16x128xf32>
      %158 = arith.addf %156, %157 : vector<16x128xf32>
      %159 = math.rsqrt %158 : vector<16x128xf32>
      %160 = vector.broadcast %0 : f32 to vector<16x128xf32>
      %161 = arith.mulf %160, %159 : vector<16x128xf32>
      %cst_63 = arith.constant 1.000000e+00 : f32
      %162 = vector.broadcast %cst_63 : f32 to vector<16x128xf32>
      %163 = arith.minimumf %161, %162 : vector<16x128xf32>
      %cst_64 = arith.constant 1.990000e+00 : f32
      %164 = vector.broadcast %cst_64 : f32 to vector<16x128xf32>
      %165 = arith.mulf %164, %163 : vector<16x128xf32>
      %166 = arith.subf %144, %125 : vector<16x128xf32>
      %cst_65 = arith.constant 1.990000e+00 : f32
      %167 = vector.broadcast %cst_65 : f32 to vector<16x128xf32>
      %168 = arith.mulf %167, %166 : vector<16x128xf32>
      %169 = arith.addf %125, %168 : vector<16x128xf32>
      %170 = vector.broadcast %cst_21 : f32 to vector<16x128xf32>
      %171 = arith.mulf %170, %129 : vector<16x128xf32>
      %172 = arith.mulf %165, %151 : vector<16x128xf32>
      %173 = arith.addf %171, %172 : vector<16x128xf32>
      %174 = vector.broadcast %cst_21 : f32 to vector<16x128xf32>
      %175 = arith.mulf %174, %133 : vector<16x128xf32>
      %176 = arith.mulf %165, %155 : vector<16x128xf32>
      %177 = arith.addf %175, %176 : vector<16x128xf32>
      %c1_i32_66 = arith.constant 1 : i32
      %178 = tpu.dynamic_rotate %173 by %c1_i32_66 dim 0 : vector<16x128xf32>, i32 -> vector<16x128xf32>
      %179 = arith.subf %178, %173 : vector<16x128xf32>
      %c1_i32_67 = arith.constant 1 : i32
      %180 = tpu.dynamic_rotate %177 by %c1_i32_67 dim 1 : vector<16x128xf32>, i32 -> vector<16x128xf32>
      %181 = arith.subf %180, %177 : vector<16x128xf32>
      %182 = arith.addf %179, %181 : vector<16x128xf32>
      %cst_68 = arith.constant 0.00999999977 : f32
      %183 = vector.broadcast %cst_68 : f32 to vector<16x128xf32>
      %184 = arith.mulf %183, %182 : vector<16x128xf32>
      %185 = arith.subf %169, %184 : vector<16x128xf32>
      %cst_69 = arith.constant 9.900990e-01 : f32
      %186 = vector.broadcast %cst_69 : f32 to vector<16x128xf32>
      %187 = arith.mulf %185, %186 : vector<16x128xf32>
      %188 = arith.addf %187, %43 : vector<16x128xf32>
      %cst_70 = arith.constant 2.000000e+00 : f32
      %189 = vector.broadcast %cst_70 : f32 to vector<16x128xf32>
      %190 = arith.mulf %189, %188 : vector<16x128xf32>
      %191 = arith.subf %190, %169 : vector<16x128xf32>
      %c15_i32_71 = arith.constant 15 : i32
      %192 = tpu.dynamic_rotate %191 by %c15_i32_71 dim 0 : vector<16x128xf32>, i32 -> vector<16x128xf32>
      %193 = arith.subf %192, %191 : vector<16x128xf32>
      %194 = arith.mulf %193, %44 : vector<16x128xf32>
      %195 = arith.addf %173, %194 : vector<16x128xf32>
      %c127_i32_72 = arith.constant 127 : i32
      %196 = tpu.dynamic_rotate %191 by %c127_i32_72 dim 1 : vector<16x128xf32>, i32 -> vector<16x128xf32>
      %197 = arith.subf %196, %191 : vector<16x128xf32>
      %198 = arith.mulf %197, %45 : vector<16x128xf32>
      %199 = arith.addf %177, %198 : vector<16x128xf32>
      %200 = arith.mulf %195, %195 : vector<16x128xf32>
      %201 = arith.mulf %199, %199 : vector<16x128xf32>
      %202 = arith.addf %200, %201 : vector<16x128xf32>
      %203 = math.rsqrt %202 : vector<16x128xf32>
      %204 = vector.broadcast %0 : f32 to vector<16x128xf32>
      %205 = arith.mulf %204, %203 : vector<16x128xf32>
      %cst_73 = arith.constant 1.000000e+00 : f32
      %206 = vector.broadcast %cst_73 : f32 to vector<16x128xf32>
      %207 = arith.minimumf %205, %206 : vector<16x128xf32>
      %cst_74 = arith.constant 1.990000e+00 : f32
      %208 = vector.broadcast %cst_74 : f32 to vector<16x128xf32>
      %209 = arith.mulf %208, %207 : vector<16x128xf32>
      %210 = arith.subf %188, %169 : vector<16x128xf32>
      %cst_75 = arith.constant 1.990000e+00 : f32
      %211 = vector.broadcast %cst_75 : f32 to vector<16x128xf32>
      %212 = arith.mulf %211, %210 : vector<16x128xf32>
      %213 = arith.addf %169, %212 : vector<16x128xf32>
      %214 = vector.broadcast %cst_21 : f32 to vector<16x128xf32>
      %215 = arith.mulf %214, %173 : vector<16x128xf32>
      %216 = arith.mulf %209, %195 : vector<16x128xf32>
      %217 = arith.addf %215, %216 : vector<16x128xf32>
      %218 = vector.broadcast %cst_21 : f32 to vector<16x128xf32>
      %219 = arith.mulf %218, %177 : vector<16x128xf32>
      %220 = arith.mulf %209, %199 : vector<16x128xf32>
      %221 = arith.addf %219, %220 : vector<16x128xf32>
      %c1_i32_76 = arith.constant 1 : i32
      %222 = tpu.dynamic_rotate %217 by %c1_i32_76 dim 0 : vector<16x128xf32>, i32 -> vector<16x128xf32>
      %223 = arith.subf %222, %217 : vector<16x128xf32>
      %c1_i32_77 = arith.constant 1 : i32
      %224 = tpu.dynamic_rotate %221 by %c1_i32_77 dim 1 : vector<16x128xf32>, i32 -> vector<16x128xf32>
      %225 = arith.subf %224, %221 : vector<16x128xf32>
      %226 = arith.addf %223, %225 : vector<16x128xf32>
      %cst_78 = arith.constant 0.00999999977 : f32
      %227 = vector.broadcast %cst_78 : f32 to vector<16x128xf32>
      %228 = arith.mulf %227, %226 : vector<16x128xf32>
      %229 = arith.subf %213, %228 : vector<16x128xf32>
      %cst_79 = arith.constant 9.900990e-01 : f32
      %230 = vector.broadcast %cst_79 : f32 to vector<16x128xf32>
      %231 = arith.mulf %229, %230 : vector<16x128xf32>
      %232 = arith.addf %231, %43 : vector<16x128xf32>
      %cst_80 = arith.constant 2.000000e+00 : f32
      %233 = vector.broadcast %cst_80 : f32 to vector<16x128xf32>
      %234 = arith.mulf %233, %232 : vector<16x128xf32>
      %235 = arith.subf %234, %213 : vector<16x128xf32>
      %c15_i32_81 = arith.constant 15 : i32
      %236 = tpu.dynamic_rotate %235 by %c15_i32_81 dim 0 : vector<16x128xf32>, i32 -> vector<16x128xf32>
      %237 = arith.subf %236, %235 : vector<16x128xf32>
      %238 = arith.mulf %237, %44 : vector<16x128xf32>
      %239 = arith.addf %217, %238 : vector<16x128xf32>
      %c127_i32_82 = arith.constant 127 : i32
      %240 = tpu.dynamic_rotate %235 by %c127_i32_82 dim 1 : vector<16x128xf32>, i32 -> vector<16x128xf32>
      %241 = arith.subf %240, %235 : vector<16x128xf32>
      %242 = arith.mulf %241, %45 : vector<16x128xf32>
      %243 = arith.addf %221, %242 : vector<16x128xf32>
      %244 = arith.mulf %239, %239 : vector<16x128xf32>
      %245 = arith.mulf %243, %243 : vector<16x128xf32>
      %246 = arith.addf %244, %245 : vector<16x128xf32>
      %247 = math.rsqrt %246 : vector<16x128xf32>
      %248 = vector.broadcast %0 : f32 to vector<16x128xf32>
      %249 = arith.mulf %248, %247 : vector<16x128xf32>
      %cst_83 = arith.constant 1.000000e+00 : f32
      %250 = vector.broadcast %cst_83 : f32 to vector<16x128xf32>
      %251 = arith.minimumf %249, %250 : vector<16x128xf32>
      %cst_84 = arith.constant 1.990000e+00 : f32
      %252 = vector.broadcast %cst_84 : f32 to vector<16x128xf32>
      %253 = arith.mulf %252, %251 : vector<16x128xf32>
      %254 = arith.subf %232, %213 : vector<16x128xf32>
      %cst_85 = arith.constant 1.990000e+00 : f32
      %255 = vector.broadcast %cst_85 : f32 to vector<16x128xf32>
      %256 = arith.mulf %255, %254 : vector<16x128xf32>
      %257 = arith.addf %213, %256 : vector<16x128xf32>
      %258 = vector.broadcast %cst_21 : f32 to vector<16x128xf32>
      %259 = arith.mulf %258, %217 : vector<16x128xf32>
      %260 = arith.mulf %253, %239 : vector<16x128xf32>
      %261 = arith.addf %259, %260 : vector<16x128xf32>
      %262 = vector.broadcast %cst_21 : f32 to vector<16x128xf32>
      %263 = arith.mulf %262, %221 : vector<16x128xf32>
      %264 = arith.mulf %253, %243 : vector<16x128xf32>
      %265 = arith.addf %263, %264 : vector<16x128xf32>
      %c1_i32_86 = arith.constant 1 : i32
      %266 = tpu.dynamic_rotate %261 by %c1_i32_86 dim 0 : vector<16x128xf32>, i32 -> vector<16x128xf32>
      %267 = arith.subf %266, %261 : vector<16x128xf32>
      %c1_i32_87 = arith.constant 1 : i32
      %268 = tpu.dynamic_rotate %265 by %c1_i32_87 dim 1 : vector<16x128xf32>, i32 -> vector<16x128xf32>
      %269 = arith.subf %268, %265 : vector<16x128xf32>
      %270 = arith.addf %267, %269 : vector<16x128xf32>
      %cst_88 = arith.constant 0.00999999977 : f32
      %271 = vector.broadcast %cst_88 : f32 to vector<16x128xf32>
      %272 = arith.mulf %271, %270 : vector<16x128xf32>
      %273 = arith.subf %257, %272 : vector<16x128xf32>
      %cst_89 = arith.constant 9.900990e-01 : f32
      %274 = vector.broadcast %cst_89 : f32 to vector<16x128xf32>
      %275 = arith.mulf %273, %274 : vector<16x128xf32>
      %276 = arith.addf %275, %43 : vector<16x128xf32>
      %cst_90 = arith.constant 2.000000e+00 : f32
      %277 = vector.broadcast %cst_90 : f32 to vector<16x128xf32>
      %278 = arith.mulf %277, %276 : vector<16x128xf32>
      %279 = arith.subf %278, %257 : vector<16x128xf32>
      %c15_i32_91 = arith.constant 15 : i32
      %280 = tpu.dynamic_rotate %279 by %c15_i32_91 dim 0 : vector<16x128xf32>, i32 -> vector<16x128xf32>
      %281 = arith.subf %280, %279 : vector<16x128xf32>
      %282 = arith.mulf %281, %44 : vector<16x128xf32>
      %283 = arith.addf %261, %282 : vector<16x128xf32>
      %c127_i32_92 = arith.constant 127 : i32
      %284 = tpu.dynamic_rotate %279 by %c127_i32_92 dim 1 : vector<16x128xf32>, i32 -> vector<16x128xf32>
      %285 = arith.subf %284, %279 : vector<16x128xf32>
      %286 = arith.mulf %285, %45 : vector<16x128xf32>
      %287 = arith.addf %265, %286 : vector<16x128xf32>
      %288 = arith.mulf %283, %283 : vector<16x128xf32>
      %289 = arith.mulf %287, %287 : vector<16x128xf32>
      %290 = arith.addf %288, %289 : vector<16x128xf32>
      %291 = math.rsqrt %290 : vector<16x128xf32>
      %292 = vector.broadcast %0 : f32 to vector<16x128xf32>
      %293 = arith.mulf %292, %291 : vector<16x128xf32>
      %cst_93 = arith.constant 1.000000e+00 : f32
      %294 = vector.broadcast %cst_93 : f32 to vector<16x128xf32>
      %295 = arith.minimumf %293, %294 : vector<16x128xf32>
      %cst_94 = arith.constant 1.990000e+00 : f32
      %296 = vector.broadcast %cst_94 : f32 to vector<16x128xf32>
      %297 = arith.mulf %296, %295 : vector<16x128xf32>
      %298 = arith.subf %276, %257 : vector<16x128xf32>
      %cst_95 = arith.constant 1.990000e+00 : f32
      %299 = vector.broadcast %cst_95 : f32 to vector<16x128xf32>
      %300 = arith.mulf %299, %298 : vector<16x128xf32>
      %301 = arith.addf %257, %300 : vector<16x128xf32>
      %302 = vector.broadcast %cst_21 : f32 to vector<16x128xf32>
      %303 = arith.mulf %302, %261 : vector<16x128xf32>
      %304 = arith.mulf %297, %283 : vector<16x128xf32>
      %305 = arith.addf %303, %304 : vector<16x128xf32>
      %306 = vector.broadcast %cst_21 : f32 to vector<16x128xf32>
      %307 = arith.mulf %306, %265 : vector<16x128xf32>
      %308 = arith.mulf %297, %287 : vector<16x128xf32>
      %309 = arith.addf %307, %308 : vector<16x128xf32>
      %c1_i32_96 = arith.constant 1 : i32
      %310 = tpu.dynamic_rotate %305 by %c1_i32_96 dim 0 : vector<16x128xf32>, i32 -> vector<16x128xf32>
      %311 = arith.subf %310, %305 : vector<16x128xf32>
      %c1_i32_97 = arith.constant 1 : i32
      %312 = tpu.dynamic_rotate %309 by %c1_i32_97 dim 1 : vector<16x128xf32>, i32 -> vector<16x128xf32>
      %313 = arith.subf %312, %309 : vector<16x128xf32>
      %314 = arith.addf %311, %313 : vector<16x128xf32>
      %cst_98 = arith.constant 0.00999999977 : f32
      %315 = vector.broadcast %cst_98 : f32 to vector<16x128xf32>
      %316 = arith.mulf %315, %314 : vector<16x128xf32>
      %317 = arith.subf %301, %316 : vector<16x128xf32>
      %cst_99 = arith.constant 9.900990e-01 : f32
      %318 = vector.broadcast %cst_99 : f32 to vector<16x128xf32>
      %319 = arith.mulf %317, %318 : vector<16x128xf32>
      %320 = arith.addf %319, %43 : vector<16x128xf32>
      %cst_100 = arith.constant 2.000000e+00 : f32
      %321 = vector.broadcast %cst_100 : f32 to vector<16x128xf32>
      %322 = arith.mulf %321, %320 : vector<16x128xf32>
      %323 = arith.subf %322, %301 : vector<16x128xf32>
      %c15_i32_101 = arith.constant 15 : i32
      %324 = tpu.dynamic_rotate %323 by %c15_i32_101 dim 0 : vector<16x128xf32>, i32 -> vector<16x128xf32>
      %325 = arith.subf %324, %323 : vector<16x128xf32>
      %326 = arith.mulf %325, %44 : vector<16x128xf32>
      %327 = arith.addf %305, %326 : vector<16x128xf32>
      %c127_i32_102 = arith.constant 127 : i32
      %328 = tpu.dynamic_rotate %323 by %c127_i32_102 dim 1 : vector<16x128xf32>, i32 -> vector<16x128xf32>
      %329 = arith.subf %328, %323 : vector<16x128xf32>
      %330 = arith.mulf %329, %45 : vector<16x128xf32>
      %331 = arith.addf %309, %330 : vector<16x128xf32>
      %332 = arith.mulf %327, %327 : vector<16x128xf32>
      %333 = arith.mulf %331, %331 : vector<16x128xf32>
      %334 = arith.addf %332, %333 : vector<16x128xf32>
      %335 = math.rsqrt %334 : vector<16x128xf32>
      %336 = vector.broadcast %0 : f32 to vector<16x128xf32>
      %337 = arith.mulf %336, %335 : vector<16x128xf32>
      %cst_103 = arith.constant 1.000000e+00 : f32
      %338 = vector.broadcast %cst_103 : f32 to vector<16x128xf32>
      %339 = arith.minimumf %337, %338 : vector<16x128xf32>
      %cst_104 = arith.constant 1.990000e+00 : f32
      %340 = vector.broadcast %cst_104 : f32 to vector<16x128xf32>
      %341 = arith.mulf %340, %339 : vector<16x128xf32>
      %342 = arith.subf %320, %301 : vector<16x128xf32>
      %cst_105 = arith.constant 1.990000e+00 : f32
      %343 = vector.broadcast %cst_105 : f32 to vector<16x128xf32>
      %344 = arith.mulf %343, %342 : vector<16x128xf32>
      %345 = arith.addf %301, %344 : vector<16x128xf32>
      %346 = vector.broadcast %cst_21 : f32 to vector<16x128xf32>
      %347 = arith.mulf %346, %305 : vector<16x128xf32>
      %348 = arith.mulf %341, %327 : vector<16x128xf32>
      %349 = arith.addf %347, %348 : vector<16x128xf32>
      %350 = vector.broadcast %cst_21 : f32 to vector<16x128xf32>
      %351 = arith.mulf %350, %309 : vector<16x128xf32>
      %352 = arith.mulf %341, %331 : vector<16x128xf32>
      %353 = arith.addf %351, %352 : vector<16x128xf32>
      %c1_i32_106 = arith.constant 1 : i32
      %354 = tpu.dynamic_rotate %349 by %c1_i32_106 dim 0 : vector<16x128xf32>, i32 -> vector<16x128xf32>
      %355 = arith.subf %354, %349 : vector<16x128xf32>
      %c1_i32_107 = arith.constant 1 : i32
      %356 = tpu.dynamic_rotate %353 by %c1_i32_107 dim 1 : vector<16x128xf32>, i32 -> vector<16x128xf32>
      %357 = arith.subf %356, %353 : vector<16x128xf32>
      %358 = arith.addf %355, %357 : vector<16x128xf32>
      %cst_108 = arith.constant 0.00999999977 : f32
      %359 = vector.broadcast %cst_108 : f32 to vector<16x128xf32>
      %360 = arith.mulf %359, %358 : vector<16x128xf32>
      %361 = arith.subf %345, %360 : vector<16x128xf32>
      %cst_109 = arith.constant 9.900990e-01 : f32
      %362 = vector.broadcast %cst_109 : f32 to vector<16x128xf32>
      %363 = arith.mulf %361, %362 : vector<16x128xf32>
      %364 = arith.addf %363, %43 : vector<16x128xf32>
      %cst_110 = arith.constant 2.000000e+00 : f32
      %365 = vector.broadcast %cst_110 : f32 to vector<16x128xf32>
      %366 = arith.mulf %365, %364 : vector<16x128xf32>
      %367 = arith.subf %366, %345 : vector<16x128xf32>
      %c15_i32_111 = arith.constant 15 : i32
      %368 = tpu.dynamic_rotate %367 by %c15_i32_111 dim 0 : vector<16x128xf32>, i32 -> vector<16x128xf32>
      %369 = arith.subf %368, %367 : vector<16x128xf32>
      %370 = arith.mulf %369, %44 : vector<16x128xf32>
      %371 = arith.addf %349, %370 : vector<16x128xf32>
      %c127_i32_112 = arith.constant 127 : i32
      %372 = tpu.dynamic_rotate %367 by %c127_i32_112 dim 1 : vector<16x128xf32>, i32 -> vector<16x128xf32>
      %373 = arith.subf %372, %367 : vector<16x128xf32>
      %374 = arith.mulf %373, %45 : vector<16x128xf32>
      %375 = arith.addf %353, %374 : vector<16x128xf32>
      %376 = arith.mulf %371, %371 : vector<16x128xf32>
      %377 = arith.mulf %375, %375 : vector<16x128xf32>
      %378 = arith.addf %376, %377 : vector<16x128xf32>
      %379 = math.rsqrt %378 : vector<16x128xf32>
      %380 = vector.broadcast %0 : f32 to vector<16x128xf32>
      %381 = arith.mulf %380, %379 : vector<16x128xf32>
      %cst_113 = arith.constant 1.000000e+00 : f32
      %382 = vector.broadcast %cst_113 : f32 to vector<16x128xf32>
      %383 = arith.minimumf %381, %382 : vector<16x128xf32>
      %cst_114 = arith.constant 1.990000e+00 : f32
      %384 = vector.broadcast %cst_114 : f32 to vector<16x128xf32>
      %385 = arith.mulf %384, %383 : vector<16x128xf32>
      %386 = arith.subf %364, %345 : vector<16x128xf32>
      %cst_115 = arith.constant 1.990000e+00 : f32
      %387 = vector.broadcast %cst_115 : f32 to vector<16x128xf32>
      %388 = arith.mulf %387, %386 : vector<16x128xf32>
      %389 = arith.addf %345, %388 : vector<16x128xf32>
      %390 = vector.broadcast %cst_21 : f32 to vector<16x128xf32>
      %391 = arith.mulf %390, %349 : vector<16x128xf32>
      %392 = arith.mulf %385, %371 : vector<16x128xf32>
      %393 = arith.addf %391, %392 : vector<16x128xf32>
      %394 = vector.broadcast %cst_21 : f32 to vector<16x128xf32>
      %395 = arith.mulf %394, %353 : vector<16x128xf32>
      %396 = arith.mulf %385, %375 : vector<16x128xf32>
      %397 = arith.addf %395, %396 : vector<16x128xf32>
      %c0_116 = arith.constant 0 : index
      %c0_117 = arith.constant 0 : index
      %398 = vector.load %arg3[%c0_116, %c0_117] : memref<16x128xf32, #tpu.memory_space<vmem>>, vector<16x128xf32>
      tpu.vector_store %arg3[%c0_116, %c0_117], %389 {strides = array<i32>} : memref<16x128xf32, #tpu.memory_space<vmem>>, vector<16x128xf32>,
      %c0_118 = arith.constant 0 : index
      %c0_119 = arith.constant 0 : index
      %399 = vector.load %arg4[%c0_118, %c0_119] : memref<16x128xf32, #tpu.memory_space<vmem>>, vector<16x128xf32>
      tpu.vector_store %arg4[%c0_118, %c0_119], %393 {strides = array<i32>} : memref<16x128xf32, #tpu.memory_space<vmem>>, vector<16x128xf32>,
      %c0_120 = arith.constant 0 : index
      %c0_121 = arith.constant 0 : index
      %400 = vector.load %arg5[%c0_120, %c0_121] : memref<16x128xf32, #tpu.memory_space<vmem>>, vector<16x128xf32>
      tpu.vector_store %arg5[%c0_120, %c0_121], %397 {strides = array<i32>} : memref<16x128xf32, #tpu.memory_space<vmem>>, vector<16x128xf32>,
      %401 = arith.subf %345, %389 : vector<16x128xf32>
      %cst_122 = arith.constant 9.99999996E-13 : f32
      %402 = vector.broadcast %cst_122 : f32 to vector<16x128xf32>
      %403 = arith.addf %389, %402 : vector<16x128xf32>
      %404 = arith.mulf %401, %401 : vector<16x128xf32>
      %405 = arith.mulf %403, %403 : vector<16x128xf32>
      %406 = vector.broadcast %cst_22 : f32 to vector<16x128xf32>
      %407 = arith.mulf %406, %405 : vector<16x128xf32>
      %408 = arith.subf %404, %407 : vector<16x128xf32>
      %409 = vector.shape_cast %408 : vector<16x128xf32> to vector<1x16x128xf32>
      %cst_123 = arith.constant dense<0.000000e+00> : vector<1xf32>
      %410 = vector.multi_reduction <add>, %409, %cst_123 [1, 2] : vector<1x16x128xf32> to vector<1xf32>
      %411 = vector.shape_cast %410 : vector<1xf32> to vector<1x1x1xf32>
      %412 = vector.extract %411[0, 0, 0] : f32 from vector<1x1x1xf32>
      %cst_124 = arith.constant 0.000000e+00 : f32
      %413 = arith.cmpf olt, %412, %cst_124 : f32
      %c1_i32_125 = arith.constant 1 : i32
      %414 = arith.addi %arg8, %c1_i32_125 : i32
      scf.yield %414, %413 : i32, i1
    }
    return
  }
  func.func @transform_0(%arg0: i32, %arg1: memref<1xf32, #tpu.memory_space<smem>>) -> (i32, i32) {
    %c0_i32 = arith.constant 0 : i32
    %c0_i32_0 = arith.constant 0 : i32
    return %c0_i32, %arg0 : i32, i32
  }
  func.func @transform_1(%arg0: i32, %arg1: memref<1xf32, #tpu.memory_space<smem>>) -> (i32, i32) {
    %c0_i32 = arith.constant 0 : i32
    %c0_i32_0 = arith.constant 0 : i32
    return %c0_i32, %arg0 : i32, i32
  }
}

</mosaic_0001>

<bundles_post_ra>
// kernel: tpu_custom_call.1
= control target key start
LH: loop header
LB: loop body
LE: loop exit
PB: predicated region body
PF: predicated region fallthrough
CT: control target
= control target key end

     0   :  { %8 = vsyncpa [#allocation9], 0  ;;  %s1405_s0 = inlined_call_operand.<no memory space> [shape: f32[1], index: 0, kind: input, shape index: {}]   ;;  %s1406_s1 = inlined_call_operand.hbm [shape: f32[16,128], index: 1, kind: input, shape index: {}]   ;;  %s1407_s2 = inlined_call_operand.hbm [shape: f32[16,128], index: 2, kind: output, shape index: {}]  }
   0x1   :  { %9 = vsyncpa [#allocation10], 0  ;;  %s876_s9 = smov [#allocation8]   ;;  %s820_s13 = scalar_lea.hbm %s1406_s1, 256 }
   0x2   :  { %s15_s10 = sshll.u32 %s876_s9, 4  ;;  %p821_p0 = scmp.ne.s32.totalorder %s1406_s1, %s820_s13  ;;  %s16_s10 = int_to_ptr.vmem [resolvable:$true] %s15_s10 }
   0x3   :  { %p824_p1 = scmp.lt.u32.totalorder %s820_s13, %s1406_s1 }
   0x5   :  { %p826_p2 = pnand %p824_p1, %p821_p0 }
   0x7   :  { %829 = shalt.err (!%p826_p2)
}
   0x8   :  { %s830_s18 = scalar_lea.vmem %s16_s10, 256  ;;  %p835_p4 = scmp.lt.s32.totalorder %s16_s10, %s16_s10 }
   0x9   :  { %p831_p3 = scmp.ne.s32.totalorder %s16_s10, %s830_s18  ;;  %p836_p5 = scmp.lt.s32.totalorder %s830_s18, %s830_s18 }
   0xb   :  { %p837_p6 = por %p836_p5, %p835_p4 }
   0xd   :  { %p838_p7 = pnand %p837_p6, %p831_p3 }
   0xf   :  { %841 = shalt.err (!%p838_p7)
}
  0x10   :  { %s877_s19 = smov 128   ;;  %s878_s20 = smov 8  }
  0x11   :  { %21 = dma.hbm_to_vmem [thread:$0]  %s1406_s1, 256, %s16_s10, [#allocation9], %s877_s19, %s877_s19, %s878_s20  }
  0x12   :  { %868 = dma.done.wait [#allocation9], 256  }
  0x13   :  { %869 = vsyncadd [#allocation9], 4294967040  ;;  %v26_v0 = vlaneseq  ;;  %v879_v1 = vmov 12.5   ;;  %v880_v2 = vmov 0.0   ;;  %v53_v9 = vld [vmem:[#allocation8] sm:$0xff]  ;;  %v54_v10 = vld [vmem:[#allocation8 + $0x8] sm:$0xff] }
  0x14   :  { %35 = vst [vmem:[#allocation4] sm:$0xff] %v879_v1  ;;  %57 = vst [vmem:[#allocation2] sm:$0xff] %v880_v2  ;;  %s917_s1 = smov 0  }
  0x15   :  { %58 = vst [vmem:[#allocation2 + $0x8] sm:$0xff] %v880_v2  ;;  %59 = vst [vmem:[#allocation3] sm:$0xff] %v880_v2  ;;  %v914_v3 = vshrl.u32 %v26_v0, 7  ;;  %v30_v4 = vand.u32 127, %v26_v0 }
  0x16   :  { %60 = vst [vmem:[#allocation3 + $0x8] sm:$0xff] %v880_v2  ;;  %55 = vst [vmem:[#allocation11] sm:$0xff] %v53_v9 }
  0x17   :  { %v28_v5 = vadd.s32 8, %v914_v3  ;;  %v41_v6 = vand.u32 15, %v30_v4  ;;  %56 = vst [vmem:[#allocation11 + $0x8] sm:$0xff] %v54_v10 }
  0x19   :  { %vm32_vm0 = vcmp.lt.s32.totalorder %v28_v5, 15  ;;  %vm49_vm1 = vcmp.lt.s32.totalorder %v41_v6, 15 }
  0x1a   :  { %v34_v7 = vsel %vm32_vm0, 12.5, %v880_v2  ;;  %v50_v8 = vsel %vm49_vm1, 12.5, %v880_v2 }
  0x1b   :  { %36 = vst [vmem:[#allocation4 + $0x8] sm:$0xff] %v34_v7  ;;  %51 = vst [vmem:[#allocation5] sm:$0xff] %v50_v8 }
  0x1c   :  { %52 = vst [vmem:[#allocation5 + $0x8] sm:$0xff] %v50_v8 }
  0x1d LB: > { %v922_v11 = vld [vmem:[#allocation3] sm:$0xff]  ;;  %s881_s23 = smov 1   ;;  %v926_v12 = vld [vmem:[#allocation3 + $0x8] sm:$0xff]  ;;  %v930_v13 = vld [vmem:[#allocation2] sm:$0xff]  ;;  %vm86_vm2 = vcmp.lt.s32.totalorder %v914_v3, 1  ;;  %s882_s24 = smov 127   ;;  %v991_v10 = vstv %s1405_s0  ;;  %s874_s1 = sphi %s917_s1, %s1408_s1  }
  0x1e   : > { %91 = vrot.lane.b32.xlu0 %v922_v11, %s881_s23  ;;  %v932_v14 = vld [vmem:[#allocation2 + $0x8] sm:$0xff]  ;;  %v84_v15 = vrot.slane %v930_v13, 7  ;;  %v76_v24 = vld [vmem:[#allocation8] sm:$0xff]  ;;  %v944_v25 = vld [vmem:[#allocation11] sm:$0xff]  ;;  %vm113_vm3 = vcmp.lt.s32.totalorder %v914_v3, 7  ;;  %s740_s27 = sadd.s32 1, %s874_s1  }
  0x1f   : > { %v85_v16 = vrot.slane %v932_v14, 7  ;;  %v947_v29 = vmul.f32 0.00990099, %v76_v24  ;;  %v77_v32 = vld [vmem:[#allocation8 + $0x8] sm:$0xff]  ;;  %v950_v33 = vld [vmem:[#allocation11 + $0x8] sm:$0xff]  ;;  %v972_v50 = vld [vmem:[#allocation4] sm:$0xff]  ;;  %s1408_s1 = smov %s740_s27 }
  0x20   : > { %v955_v37 = vmul.f32 0.00990099, %v77_v32  ;;  %p64_p9 = scmp.lt.s32.totalorder %s740_s27, 125 }
  0x21   : > { %v88_v17 = vsel %vm86_vm2, %v85_v16, %v84_v15  ;;  %v87_v20 = vsel %vm86_vm2, %v84_v15, %v85_v16 }
  0x22   : > { %93 = vrot.lane.b32.xlu0 %v926_v12, %s881_s23  ;;  %v89_v18 = vsub.f32 %v88_v17, %v930_v13  ;;  %v90_v23 = vsub.f32 %v87_v20, %v932_v14  ;;  %v975_v53 = vld [vmem:[#allocation5] sm:$0xff]  ;;  %v977_v55 = vld [vmem:[#allocation4 + $0x8] sm:$0xff] }
  0x23   : > { %v982_v60 = vld [vmem:[#allocation5 + $0x8] sm:$0xff] }
  0x90   : > { %v92_v19 = vpop.permute.xlu0 %91 }
  0x91   : > { %v95_v21 = vsub.f32 %v92_v19, %v922_v11 }
  0x93   : > { %v97_v22 = vadd.f32 %v95_v21, %v89_v18  ;;  %v159_v21 = vmul.f32 -0.99, %v922_v11 }
  0x94   : > { %v94_v26 = vpop.permute.xlu0 %93 }
  0x95   : > { %v99_v27 = vmul.f32 0.01, %v97_v22  ;;  %v96_v28 = vsub.f32 %v94_v26, %v926_v12 }
  0x97   : > { %v101_v30 = vsub.f32 %v944_v25, %v99_v27  ;;  %v98_v31 = vadd.f32 %v96_v28, %v90_v23  ;;  %v160_v27 = vmul.f32 -0.99, %v926_v12 }
  0x99   : > { %v103_v34 = vmul.f32 0.990099, %v101_v30  ;;  %v100_v35 = vmul.f32 0.01, %v98_v31  ;;  %v154_v31 = vmul.f32 -0.99, %v932_v14 }
  0x9b   : > { %v953_v36 = vadd.f32 %v103_v34, %v947_v29  ;;  %v102_v38 = vsub.f32 %v950_v33, %v100_v35  ;;  %v153_v34 = vmul.f32 -0.99, %v930_v13 }
  0x9d   : > { %v104_v39 = vmul.f32 0.990099, %v102_v38  ;;  %v107_v40 = vmul.f32 2.0, %v953_v36 }
  0x9f   : > { %v960_v41 = vadd.f32 %v104_v39, %v955_v37  ;;  %v109_v42 = vsub.f32 %v107_v40, %v944_v25  ;;  %v147_v39 = vsub.f32 %v953_v36, %v944_v25 }
  0xa1   : > { %122 = vrot.lane.b32.xlu1 %v109_v42, %s882_s24  ;;  %v108_v43 = vmul.f32 2.0, %v960_v41  ;;  %v111_v46 = vrot.slane %v109_v42, 1 }
  0xa3   : > { %v110_v44 = vsub.f32 %v108_v43, %v950_v33  ;;  %v149_v43 = vmul.f32 1.99, %v147_v39 }
  0xa5   : > { %124 = vrot.lane.b32.xlu1 %v110_v44, %s882_s24  ;;  %v112_v45 = vrot.slane %v110_v44, 1  ;;  %v151_v36 = vadd.f32 %v149_v43, %v944_v25 }
  0xa7   : > { %v114_v47 = vsel %vm113_vm3, %v111_v46, %v112_v45  ;;  %v115_v49 = vsel %vm113_vm3, %v112_v45, %v111_v46 }
  0xa8   : > { %v116_v48 = vsub.f32 %v114_v47, %v109_v42  ;;  %v117_v51 = vsub.f32 %v115_v49, %v110_v44 }
  0xaa   : > { %v118_v52 = vmul.f32 %v116_v48, %v972_v50  ;;  %v119_v59 = vmul.f32 %v117_v51, %v977_v55 }
  0xac   : > { %v120_v57 = vadd.f32 %v118_v52, %v930_v13  ;;  %v121_v2 = vadd.f32 %v119_v59, %v932_v14 }
  0xae   : > { %v132_v0 = vmul.f32 %v120_v57, %v120_v57  ;;  %v133_v7 = vmul.f32 %v121_v2, %v121_v2 }
 0x113   : > { %v123_v54 = vpop.permute.xlu1 %122 }
 0x114   : > { %v126_v56 = vsub.f32 %v123_v54, %v109_v42 }
 0x116   : > { %v128_v58 = vmul.f32 %v126_v56, %v975_v53 }
 0x117   : > { %v125_v61 = vpop.permute.xlu1 %124 }
 0x118   : > { %v130_v62 = vadd.f32 %v128_v58, %v922_v11  ;;  %v127_v63 = vsub.f32 %v125_v61, %v110_v44  ;;  %v148_v44 = vsub.f32 %v960_v41, %v950_v33 }
 0x11a   : > { %v134_v1 = vmul.f32 %v130_v62, %v130_v62  ;;  %v129_v4 = vmul.f32 %v127_v63, %v982_v60  ;;  %v150_v49 = vmul.f32 1.99, %v148_v44 }
 0x11c   : > { %v136_v5 = vadd.f32 %v134_v1, %v132_v0  ;;  %v131_v6 = vadd.f32 %v129_v4, %v926_v12  ;;  %v152_v41 = vadd.f32 %v150_v49, %v950_v33 }
 0x11e   : > { %784 = vrsqrt.f32 %v136_v5  ;;  %v135_v8 = vmul.f32 %v131_v6, %v131_v6 }
 0x120   : > { %v137_v9 = vadd.f32 %v135_v8, %v133_v7 }
 0x122   : > { %786 = vrsqrt.f32 %v137_v9 }
 0x128   : > { %v785_v15 = vpop.eup %784 }
 0x129   : > { %v141_v16 = vmul.f32 %v785_v15, %v991_v10 }
 0x12b   : > { %v143_v17 = vmin.f32 %v141_v16, 1.0 }
 0x12c   : > { %v787_v18 = vpop.eup %786 }
 0x12d   : > { %v145_v19 = vmul.f32 1.99, %v143_v17  ;;  %v142_v20 = vmul.f32 %v787_v18, %v991_v10 }
 0x12f   : > { %v161_v22 = vmul.f32 %v145_v19, %v130_v62  ;;  %v144_v23 = vmin.f32 %v142_v20, 1.0  ;;  %v155_v11 = vmul.f32 %v145_v19, %v120_v57 }
 0x131   : > { %v146_v24 = vmul.f32 1.99, %v144_v23  ;;  %v996_v26 = vadd.f32 %v161_v22, %v159_v21  ;;  %v1009_v38 = vadd.f32 %v155_v11, %v153_v34 }
 0x133   : > { %v162_v28 = vmul.f32 %v146_v24, %v131_v6  ;;  %171 = vrot.lane.b32.xlu0 %v996_v26, %s881_s23  ;;  %v156_v32 = vmul.f32 %v146_v24, %v121_v2  ;;  %v165_v40 = vrot.slane %v1009_v38, 7 }
 0x135   : > { %v1001_v30 = vadd.f32 %v162_v28, %v160_v27  ;;  %v1007_v35 = vadd.f32 %v156_v32, %v154_v31 }
 0x137   : > { %173 = vrot.lane.b32.xlu1 %v1001_v30, %s881_s23  ;;  %v166_v12 = vrot.slane %v1007_v35, 7 }
 0x139   : > { %v168_v42 = vsel %vm86_vm2, %v166_v12, %v165_v40  ;;  %v167_v46 = vsel %vm86_vm2, %v165_v40, %v166_v12 }
 0x13a   : > { %v169_v13 = vsub.f32 %v168_v42, %v1009_v38  ;;  %v170_v52 = vsub.f32 %v167_v46, %v1007_v35 }
 0x1a5   : > { %v172_v14 = vpop.permute.xlu0 %171 }
 0x1a6   : > { %v175_v45 = vsub.f32 %v172_v14, %v996_v26 }
 0x1a8   : > { %v177_v47 = vadd.f32 %v175_v45, %v169_v13 }
 0x1a9   : > { %v174_v48 = vpop.permute.xlu1 %173 }
 0x1aa   : > { %v179_v51 = vmul.f32 0.01, %v177_v47  ;;  %v176_v54 = vsub.f32 %v174_v48, %v1001_v30 }
 0x1ac   : > { %v181_v56 = vsub.f32 %v151_v36, %v179_v51  ;;  %v178_v57 = vadd.f32 %v176_v54, %v170_v52  ;;  %v237_v54 = vmul.f32 -0.99, %v996_v26 }
 0x1ae   : > { %v183_v58 = vmul.f32 0.990099, %v181_v56  ;;  %v180_v59 = vmul.f32 0.01, %v178_v57 }
 0x1b0   : > { %v185_v61 = vadd.f32 %v183_v58, %v947_v29  ;;  %v182_v62 = vsub.f32 %v152_v41, %v180_v59  ;;  %v238_v58 = vmul.f32 -0.99, %v1001_v30 }
 0x1b2   : > { %v225_v63 = vsub.f32 %v185_v61, %v151_v36  ;;  %v184_v0 = vmul.f32 0.990099, %v182_v62  ;;  %v187_v1 = vmul.f32 2.0, %v185_v61 }
 0x1b4   : > { %v227_v25 = vmul.f32 1.99, %v225_v63  ;;  %v186_v2 = vadd.f32 %v184_v0, %v955_v37  ;;  %v189_v4 = vsub.f32 %v187_v1, %v151_v36  ;;  %v232_v63 = vmul.f32 -0.99, %v1007_v35 }
 0x1b6   : > { %v1029_v5 = vadd.f32 %v227_v25, %v151_v36  ;;  %v226_v6 = vsub.f32 %v186_v2, %v152_v41  ;;  %201 = vrot.lane.b32.xlu0 %v189_v4, %s882_s24  ;;  %v188_v7 = vmul.f32 2.0, %v186_v2  ;;  %v191_v16 = vrot.slane %v189_v4, 1 }
 0x1b8   : > { %v228_v8 = vmul.f32 1.99, %v226_v6  ;;  %v190_v33 = vsub.f32 %v188_v7, %v152_v41 }
 0x1ba   : > { %v1032_v9 = vadd.f32 %v228_v8, %v152_v41  ;;  %203 = vrot.lane.b32.xlu1 %v190_v33, %s882_s24  ;;  %v192_v15 = vrot.slane %v190_v33, 1 }
 0x1bc   : > { %v193_v17 = vsel %vm113_vm3, %v191_v16, %v192_v15  ;;  %v194_v19 = vsel %vm113_vm3, %v192_v15, %v191_v16 }
 0x1bd   : > { %v195_v18 = vsub.f32 %v193_v17, %v189_v4  ;;  %v196_v20 = vsub.f32 %v194_v19, %v190_v33 }
 0x1bf   : > { %v197_v21 = vmul.f32 %v195_v18, %v972_v50  ;;  %v198_v28 = vmul.f32 %v196_v20, %v977_v55 }
 0x1c1   : > { %v199_v24 = vadd.f32 %v197_v21, %v1009_v38  ;;  %v200_v39 = vadd.f32 %v198_v28, %v1007_v35 }
 0x1c3   : > { %v211_v34 = vmul.f32 %v199_v24, %v199_v24  ;;  %v212_v14 = vmul.f32 %v200_v39, %v200_v39 }
 0x228   : > { %v202_v22 = vpop.permute.xlu0 %201 }
 0x229   : > { %v205_v23 = vsub.f32 %v202_v22, %v189_v4 }
 0x22b   : > { %v207_v27 = vmul.f32 %v205_v23, %v975_v53 }
 0x22c   : > { %v204_v31 = vpop.permute.xlu1 %203 }
 0x22d   : > { %v209_v32 = vadd.f32 %v207_v27, %v996_v26  ;;  %v206_v11 = vsub.f32 %v204_v31, %v190_v33  ;;  %v231_v26 = vmul.f32 -0.99, %v1009_v38 }
 0x22f   : > { %v213_v12 = vmul.f32 %v209_v32, %v209_v32  ;;  %v208_v40 = vmul.f32 %v206_v11, %v982_v60 }
 0x231   : > { %v215_v42 = vadd.f32 %v213_v12, %v211_v34  ;;  %v210_v43 = vadd.f32 %v208_v40, %v1001_v30 }
 0x233   : > { %788 = vrsqrt.f32 %v215_v42  ;;  %v214_v44 = vmul.f32 %v210_v43, %v210_v43 }
 0x235   : > { %v216_v13 = vadd.f32 %v214_v44, %v212_v14 }
 0x237   : > { %790 = vrsqrt.f32 %v216_v13 }
 0x23d   : > { %v789_v45 = vpop.eup %788 }
 0x23e   : > { %v219_v46 = vmul.f32 %v789_v45, %v991_v10 }
 0x240   : > { %v221_v47 = vmin.f32 %v219_v46, 1.0 }
 0x241   : > { %v791_v36 = vpop.eup %790 }
 0x242   : > { %v223_v48 = vmul.f32 1.99, %v221_v47  ;;  %v220_v49 = vmul.f32 %v791_v36, %v991_v10 }
 0x244   : > { %v239_v51 = vmul.f32 %v223_v48, %v209_v32  ;;  %v222_v52 = vmin.f32 %v220_v49, 1.0  ;;  %v233_v62 = vmul.f32 %v223_v48, %v199_v24 }
 0x246   : > { %v224_v56 = vmul.f32 1.99, %v222_v52  ;;  %v1050_v57 = vadd.f32 %v239_v51, %v237_v54  ;;  %v1063_v1 = vadd.f32 %v233_v62, %v231_v26 }
 0x248   : > { %v240_v41 = vmul.f32 %v224_v56, %v210_v43  ;;  %249 = vrot.lane.b32.xlu0 %v1050_v57, %s881_s23  ;;  %v234_v61 = vmul.f32 %v224_v56, %v200_v39  ;;  %v243_v2 = vrot.slane %v1063_v1, 7 }
 0x24a   : > { %v1055_v59 = vadd.f32 %v240_v41, %v238_v58  ;;  %v1060_v0 = vadd.f32 %v234_v61, %v232_v63 }
 0x24c   : > { %251 = vrot.lane.b32.xlu1 %v1055_v59, %s881_s23  ;;  %v244_v25 = vrot.slane %v1060_v0, 7 }
 0x24e   : > { %v246_v30 = vsel %vm86_vm2, %v244_v25, %v243_v2  ;;  %v245_v35 = vsel %vm86_vm2, %v243_v2, %v244_v25 }
 0x24f   : > { %v247_v6 = vsub.f32 %v246_v30, %v1063_v1  ;;  %v248_v15 = vsub.f32 %v245_v35, %v1060_v0 }
 0x2ba   : > { %v250_v4 = vpop.permute.xlu0 %249 }
 0x2bb   : > { %v253_v7 = vsub.f32 %v250_v4, %v1050_v57 }
 0x2bd   : > { %v255_v8 = vadd.f32 %v253_v7, %v247_v6 }
 0x2be   : > { %v252_v33 = vpop.permute.xlu1 %251 }
 0x2bf   : > { %v257_v38 = vmul.f32 0.01, %v255_v8  ;;  %v254_v16 = vsub.f32 %v252_v33, %v1055_v59 }
 0x2c1   : > { %v259_v17 = vsub.f32 %v1029_v5, %v257_v38  ;;  %v256_v18 = vadd.f32 %v254_v16, %v248_v15  ;;  %v315_v15 = vmul.f32 -0.99, %v1050_v57 }
 0x2c3   : > { %v261_v19 = vmul.f32 0.990099, %v259_v17  ;;  %v258_v20 = vmul.f32 0.01, %v256_v18 }
 0x2c5   : > { %v263_v21 = vadd.f32 %v261_v19, %v947_v29  ;;  %v260_v22 = vsub.f32 %v1032_v9, %v258_v20  ;;  %v316_v19 = vmul.f32 -0.99, %v1055_v59 }
 0x2c7   : > { %v303_v23 = vsub.f32 %v263_v21, %v1029_v5  ;;  %v262_v24 = vmul.f32 0.990099, %v260_v22  ;;  %v265_v27 = vmul.f32 2.0, %v263_v21 }
 0x2c9   : > { %v305_v28 = vmul.f32 1.99, %v303_v23  ;;  %v264_v31 = vadd.f32 %v262_v24, %v955_v37  ;;  %v267_v32 = vsub.f32 %v265_v27, %v1029_v5  ;;  %v310_v23 = vmul.f32 -0.99, %v1060_v0 }
 0x2cb   : > { %v1082_v11 = vadd.f32 %v305_v28, %v1029_v5  ;;  %v304_v34 = vsub.f32 %v264_v31, %v1032_v9  ;;  %279 = vrot.lane.b32.xlu0 %v267_v32, %s882_s24  ;;  %v266_v12 = vmul.f32 2.0, %v264_v31  ;;  %v269_v14 = vrot.slane %v267_v32, 1 }
 0x2cd   : > { %v306_v39 = vmul.f32 1.99, %v304_v34  ;;  %v268_v40 = vsub.f32 %v266_v12, %v1032_v9 }
 0x2cf   : > { %v1088_v42 = vadd.f32 %v306_v39, %v1032_v9  ;;  %281 = vrot.lane.b32.xlu1 %v268_v40, %s882_s24  ;;  %v270_v43 = vrot.slane %v268_v40, 1 }
 0x2d1   : > { %v271_v44 = vsel %vm113_vm3, %v269_v14, %v270_v43  ;;  %v272_v13 = vsel %vm113_vm3, %v270_v43, %v269_v14 }
 0x2d2   : > { %v273_v5 = vsub.f32 %v271_v44, %v267_v32  ;;  %v274_v45 = vsub.f32 %v272_v13, %v268_v40 }
 0x2d4   : > { %v275_v46 = vmul.f32 %v273_v5, %v972_v50  ;;  %v276_v49 = vmul.f32 %v274_v45, %v977_v55 }
 0x2d6   : > { %v277_v48 = vadd.f32 %v275_v46, %v1063_v1  ;;  %v278_v58 = vadd.f32 %v276_v49, %v1060_v0 }
 0x2d8   : > { %v289_v56 = vmul.f32 %v277_v48, %v277_v48  ;;  %v290_v26 = vmul.f32 %v278_v58, %v278_v58 }
 0x33d   : > { %v280_v47 = vpop.permute.xlu0 %279 }
 0x33e   : > { %v283_v36 = vsub.f32 %v280_v47, %v267_v32 }
 0x340   : > { %v285_v9 = vmul.f32 %v283_v36, %v975_v53 }
 0x341   : > { %v282_v51 = vpop.permute.xlu1 %281 }
 0x342   : > { %v287_v52 = vadd.f32 %v285_v9, %v1050_v57  ;;  %v284_v54 = vsub.f32 %v282_v51, %v268_v40  ;;  %v309_v57 = vmul.f32 -0.99, %v1063_v1 }
 0x344   : > { %v291_v41 = vmul.f32 %v287_v52, %v287_v52  ;;  %v286_v61 = vmul.f32 %v284_v54, %v982_v60 }
 0x346   : > { %v293_v62 = vadd.f32 %v291_v41, %v289_v56  ;;  %v288_v63 = vadd.f32 %v286_v61, %v1055_v59 }
 0x348   : > { %792 = vrsqrt.f32 %v293_v62  ;;  %v292_v25 = vmul.f32 %v288_v63, %v288_v63 }
 0x34a   : > { %v294_v2 = vadd.f32 %v292_v25, %v290_v26 }
 0x34c   : > { %794 = vrsqrt.f32 %v294_v2 }
 0x352   : > { %v793_v30 = vpop.eup %792 }
 0x353   : > { %v297_v4 = vmul.f32 %v793_v30, %v991_v10 }
 0x355   : > { %v299_v6 = vmin.f32 %v297_v4, 1.0 }
 0x356   : > { %v795_v7 = vpop.eup %794 }
 0x357   : > { %v301_v35 = vmul.f32 1.99, %v299_v6  ;;  %v298_v8 = vmul.f32 %v795_v7, %v991_v10 }
 0x359   : > { %v317_v33 = vmul.f32 %v301_v35, %v287_v52  ;;  %v300_v38 = vmin.f32 %v298_v8, 1.0  ;;  %v311_v22 = vmul.f32 %v301_v35, %v277_v48 }
 0x35b   : > { %v302_v16 = vmul.f32 1.99, %v300_v38  ;;  %v1106_v17 = vadd.f32 %v317_v33, %v315_v15  ;;  %v1119_v27 = vadd.f32 %v311_v22, %v309_v57 }
 0x35d   : > { %v318_v18 = vmul.f32 %v302_v16, %v288_v63  ;;  %327 = vrot.lane.b32.xlu0 %v1106_v17, %s881_s23  ;;  %v312_v21 = vmul.f32 %v302_v16, %v278_v58  ;;  %v321_v31 = vrot.slane %v1119_v27, 7 }
 0x35f   : > { %v1111_v20 = vadd.f32 %v318_v18, %v316_v19  ;;  %v1116_v24 = vadd.f32 %v312_v21, %v310_v23 }
 0x361   : > { %329 = vrot.lane.b32.xlu1 %v1111_v20, %s881_s23  ;;  %v322_v28 = vrot.slane %v1116_v24, 7 }
 0x363   : > { %v324_v59 = vsel %vm86_vm2, %v322_v28, %v321_v31  ;;  %v323_v0 = vsel %vm86_vm2, %v321_v31, %v322_v28 }
 0x364   : > { %v325_v34 = vsub.f32 %v324_v59, %v1119_v27  ;;  %v326_v43 = vsub.f32 %v323_v0, %v1116_v24 }
 0x3cf   : > { %v328_v32 = vpop.permute.xlu0 %327 }
 0x3d0   : > { %v331_v12 = vsub.f32 %v328_v32, %v1106_v17 }
 0x3d2   : > { %v333_v39 = vadd.f32 %v331_v12, %v325_v34 }
 0x3d3   : > { %v330_v40 = vpop.permute.xlu1 %329 }
 0x3d4   : > { %v335_v1 = vmul.f32 0.01, %v333_v39  ;;  %v332_v14 = vsub.f32 %v330_v40, %v1111_v20 }
 0x3d6   : > { %v337_v44 = vsub.f32 %v1082_v11, %v335_v1  ;;  %v334_v5 = vadd.f32 %v332_v14, %v326_v43  ;;  %v393_v43 = vmul.f32 -0.99, %v1106_v17 }
 0x3d8   : > { %v339_v13 = vmul.f32 0.990099, %v337_v44  ;;  %v336_v45 = vmul.f32 0.01, %v334_v5 }
 0x3da   : > { %v341_v46 = vadd.f32 %v339_v13, %v947_v29  ;;  %v338_v47 = vsub.f32 %v1088_v42, %v336_v45  ;;  %v394_v13 = vmul.f32 -0.99, %v1111_v20 }
 0x3dc   : > { %v381_v36 = vsub.f32 %v341_v46, %v1082_v11  ;;  %v340_v48 = vmul.f32 0.990099, %v338_v47  ;;  %v343_v9 = vmul.f32 2.0, %v341_v46 }
 0x3de   : > { %v383_v49 = vmul.f32 1.99, %v381_v36  ;;  %v342_v51 = vadd.f32 %v340_v48, %v955_v37  ;;  %v345_v52 = vsub.f32 %v343_v9, %v1082_v11  ;;  %v388_v36 = vmul.f32 -0.99, %v1116_v24 }
 0x3e0   : > { %v1138_v54 = vadd.f32 %v383_v49, %v1082_v11  ;;  %v382_v56 = vsub.f32 %v342_v51, %v1088_v42  ;;  %357 = vrot.lane.b32.xlu0 %v345_v52, %s882_s24  ;;  %v344_v41 = vmul.f32 2.0, %v342_v51  ;;  %v347_v26 = vrot.slane %v345_v52, 1 }
 0x3e2   : > { %v384_v58 = vmul.f32 1.99, %v382_v56  ;;  %v346_v61 = vsub.f32 %v344_v41, %v1088_v42 }
 0x3e4   : > { %v1144_v62 = vadd.f32 %v384_v58, %v1088_v42  ;;  %359 = vrot.lane.b32.xlu1 %v346_v61, %s882_s24  ;;  %v348_v63 = vrot.slane %v346_v61, 1 }
 0x3e6   : > { %v349_v25 = vsel %vm113_vm3, %v347_v26, %v348_v63  ;;  %v350_v2 = vsel %vm113_vm3, %v348_v63, %v347_v26 }
 0x3e7   : > { %v351_v11 = vsub.f32 %v349_v25, %v345_v52  ;;  %v352_v30 = vsub.f32 %v350_v2, %v346_v61 }
 0x3e9   : > { %v353_v4 = vmul.f32 %v351_v11, %v972_v50  ;;  %v354_v8 = vmul.f32 %v352_v30, %v977_v55 }
 0x3eb   : > { %v355_v35 = vadd.f32 %v353_v4, %v1119_v27  ;;  %v356_v19 = vadd.f32 %v354_v8, %v1116_v24 }
 0x3ed   : > { %v367_v16 = vmul.f32 %v355_v35, %v355_v35  ;;  %v368_v57 = vmul.f32 %v356_v19, %v356_v19 }
 0x452   : > { %v358_v6 = vpop.permute.xlu0 %357 }
 0x453   : > { %v361_v7 = vsub.f32 %v358_v6, %v345_v52 }
 0x455   : > { %v363_v42 = vmul.f32 %v361_v7, %v975_v53 }
 0x456   : > { %v360_v33 = vpop.permute.xlu1 %359 }
 0x457   : > { %v365_v38 = vadd.f32 %v363_v42, %v1106_v17  ;;  %v362_v15 = vsub.f32 %v360_v33, %v346_v61  ;;  %v387_v17 = vmul.f32 -0.99, %v1119_v27 }
 0x459   : > { %v369_v18 = vmul.f32 %v365_v38, %v365_v38  ;;  %v364_v21 = vmul.f32 %v362_v15, %v982_v60 }
 0x45b   : > { %v371_v22 = vadd.f32 %v369_v18, %v367_v16  ;;  %v366_v23 = vadd.f32 %v364_v21, %v1111_v20 }
 0x45d   : > { %796 = vrsqrt.f32 %v371_v22  ;;  %v370_v28 = vmul.f32 %v366_v23, %v366_v23 }
 0x45f   : > { %v372_v31 = vadd.f32 %v370_v28, %v368_v57 }
 0x461   : > { %798 = vrsqrt.f32 %v372_v31 }
 0x467   : > { %v797_v59 = vpop.eup %796 }
 0x468   : > { %v375_v32 = vmul.f32 %v797_v59, %v991_v10 }
 0x46a   : > { %v377_v34 = vmin.f32 %v375_v32, 1.0 }
 0x46b   : > { %v799_v12 = vpop.eup %798 }
 0x46c   : > { %v379_v0 = vmul.f32 1.99, %v377_v34  ;;  %v376_v39 = vmul.f32 %v799_v12, %v991_v10 }
 0x46e   : > { %v395_v40 = vmul.f32 %v379_v0, %v365_v38  ;;  %v378_v1 = vmin.f32 %v376_v39, 1.0  ;;  %v389_v47 = vmul.f32 %v379_v0, %v355_v35 }
 0x470   : > { %v380_v14 = vmul.f32 1.99, %v378_v1  ;;  %v1162_v44 = vadd.f32 %v395_v40, %v393_v43  ;;  %v1175_v9 = vadd.f32 %v389_v47, %v387_v17 }
 0x472   : > { %v396_v5 = vmul.f32 %v380_v14, %v366_v23  ;;  %405 = vrot.lane.b32.xlu0 %v1162_v44, %s881_s23  ;;  %v390_v46 = vmul.f32 %v380_v14, %v356_v19  ;;  %v399_v51 = vrot.slane %v1175_v9, 7 }
 0x474   : > { %v1167_v45 = vadd.f32 %v396_v5, %v394_v13  ;;  %v1172_v48 = vadd.f32 %v390_v46, %v388_v36 }
 0x476   : > { %407 = vrot.lane.b32.xlu1 %v1167_v45, %s881_s23  ;;  %v400_v49 = vrot.slane %v1172_v48, 7 }
 0x478   : > { %v402_v20 = vsel %vm86_vm2, %v400_v49, %v399_v51  ;;  %v401_v24 = vsel %vm86_vm2, %v399_v51, %v400_v49 }
 0x479   : > { %v403_v56 = vsub.f32 %v402_v20, %v1175_v9  ;;  %v404_v63 = vsub.f32 %v401_v24, %v1172_v48 }
 0x4e4   : > { %v406_v52 = vpop.permute.xlu0 %405 }
 0x4e5   : > { %v409_v41 = vsub.f32 %v406_v52, %v1162_v44 }
 0x4e7   : > { %v411_v58 = vadd.f32 %v409_v41, %v403_v56 }
 0x4e8   : > { %v408_v61 = vpop.permute.xlu1 %407 }
 0x4e9   : > { %v413_v27 = vmul.f32 0.01, %v411_v58  ;;  %v410_v26 = vsub.f32 %v408_v61, %v1167_v45 }
 0x4eb   : > { %v415_v25 = vsub.f32 %v1138_v54, %v413_v27  ;;  %v412_v11 = vadd.f32 %v410_v26, %v404_v63  ;;  %v471_v63 = vmul.f32 -0.99, %v1162_v44 }
 0x4ed   : > { %v417_v2 = vmul.f32 0.990099, %v415_v25  ;;  %v414_v30 = vmul.f32 0.01, %v412_v11 }
 0x4ef   : > { %v419_v4 = vadd.f32 %v417_v2, %v947_v29  ;;  %v416_v6 = vsub.f32 %v1144_v62, %v414_v30  ;;  %v472_v2 = vmul.f32 -0.99, %v1167_v45 }
 0x4f1   : > { %v459_v7 = vsub.f32 %v419_v4, %v1138_v54  ;;  %v418_v35 = vmul.f32 0.990099, %v416_v6  ;;  %v421_v42 = vmul.f32 2.0, %v419_v4 }
 0x4f3   : > { %v461_v8 = vmul.f32 1.99, %v459_v7  ;;  %v420_v33 = vadd.f32 %v418_v35, %v955_v37  ;;  %v423_v38 = vsub.f32 %v421_v42, %v1138_v54  ;;  %v466_v7 = vmul.f32 -0.99, %v1172_v48 }
 0x4f5   : > { %v1194_v15 = vadd.f32 %v461_v8, %v1138_v54  ;;  %v460_v16 = vsub.f32 %v420_v33, %v1144_v62  ;;  %435 = vrot.lane.b32.xlu0 %v423_v38, %s882_s24  ;;  %v422_v18 = vmul.f32 2.0, %v420_v33  ;;  %v425_v57 = vrot.slane %v423_v38, 1 }
 0x4f7   : > { %v462_v19 = vmul.f32 1.99, %v460_v16  ;;  %v424_v21 = vsub.f32 %v422_v18, %v1144_v62 }
 0x4f9   : > { %v1200_v22 = vadd.f32 %v462_v19, %v1144_v62  ;;  %437 = vrot.lane.b32.xlu1 %v424_v21, %s882_s24  ;;  %v426_v23 = vrot.slane %v424_v21, 1 }
 0x4fb   : > { %v427_v28 = vsel %vm113_vm3, %v425_v57, %v426_v23  ;;  %v428_v31 = vsel %vm113_vm3, %v426_v23, %v425_v57 }
 0x4fc   : > { %v429_v54 = vsub.f32 %v427_v28, %v423_v38  ;;  %v430_v59 = vsub.f32 %v428_v31, %v424_v21 }
 0x4fe   : > { %v431_v32 = vmul.f32 %v429_v54, %v972_v50  ;;  %v432_v39 = vmul.f32 %v430_v59, %v977_v55 }
 0x500   : > { %v433_v0 = vadd.f32 %v431_v32, %v1175_v9  ;;  %v434_v13 = vadd.f32 %v432_v39, %v1172_v48 }
 0x502   : > { %v445_v14 = vmul.f32 %v433_v0, %v433_v0  ;;  %v446_v17 = vmul.f32 %v434_v13, %v434_v13 }
 0x567   : > { %v436_v34 = vpop.permute.xlu0 %435 }
 0x568   : > { %v439_v12 = vsub.f32 %v436_v34, %v423_v38 }
 0x56a   : > { %v441_v62 = vmul.f32 %v439_v12, %v975_v53 }
 0x56b   : > { %v438_v40 = vpop.permute.xlu1 %437 }
 0x56c   : > { %v443_v1 = vadd.f32 %v441_v62, %v1162_v44  ;;  %v440_v43 = vsub.f32 %v438_v40, %v424_v21  ;;  %v465_v44 = vmul.f32 -0.99, %v1175_v9 }
 0x56e   : > { %v447_v5 = vmul.f32 %v443_v1, %v443_v1  ;;  %v442_v46 = vmul.f32 %v440_v43, %v982_v60 }
 0x570   : > { %v449_v47 = vadd.f32 %v447_v5, %v445_v14  ;;  %v444_v36 = vadd.f32 %v442_v46, %v1167_v45 }
 0x572   : > { %800 = vrsqrt.f32 %v449_v47  ;;  %v448_v49 = vmul.f32 %v444_v36, %v444_v36 }
 0x574   : > { %v450_v51 = vadd.f32 %v448_v49, %v446_v17 }
 0x576   : > { %802 = vrsqrt.f32 %v450_v51 }
 0x57c   : > { %v801_v20 = vpop.eup %800 }
 0x57d   : > { %v453_v52 = vmul.f32 %v801_v20, %v991_v10 }
 0x57f   : > { %v455_v56 = vmin.f32 %v453_v52, 1.0 }
 0x580   : > { %v803_v41 = vpop.eup %802 }
 0x581   : > { %v457_v24 = vmul.f32 1.99, %v455_v56  ;;  %v454_v58 = vmul.f32 %v803_v41, %v991_v10 }
 0x583   : > { %v473_v61 = vmul.f32 %v457_v24, %v443_v1  ;;  %v456_v27 = vmin.f32 %v454_v58, 1.0  ;;  %v467_v6 = vmul.f32 %v457_v24, %v433_v0 }
 0x585   : > { %v458_v26 = vmul.f32 1.99, %v456_v27  ;;  %v1218_v25 = vadd.f32 %v473_v61, %v471_v63  ;;  %v1231_v42 = vadd.f32 %v467_v6, %v465_v44 }
 0x587   : > { %v474_v11 = vmul.f32 %v458_v26, %v444_v36  ;;  %483 = vrot.lane.b32.xlu0 %v1218_v25, %s881_s23  ;;  %v468_v4 = vmul.f32 %v458_v26, %v434_v13  ;;  %v477_v33 = vrot.slane %v1231_v42, 7 }
 0x589   : > { %v1223_v30 = vadd.f32 %v474_v11, %v472_v2  ;;  %v1228_v35 = vadd.f32 %v468_v4, %v466_v7 }
 0x58b   : > { %485 = vrot.lane.b32.xlu1 %v1223_v30, %s881_s23  ;;  %v478_v8 = vrot.slane %v1228_v35, 7 }
 0x58d   : > { %v480_v45 = vsel %vm86_vm2, %v478_v8, %v477_v33  ;;  %v479_v48 = vsel %vm86_vm2, %v477_v33, %v478_v8 }
 0x58e   : > { %v481_v16 = vsub.f32 %v480_v45, %v1231_v42  ;;  %v482_v23 = vsub.f32 %v479_v48, %v1228_v35 }
 0x5f9   : > { %v484_v38 = vpop.permute.xlu0 %483 }
 0x5fa   : > { %v487_v18 = vsub.f32 %v484_v38, %v1218_v25 }
 0x5fc   : > { %v489_v19 = vadd.f32 %v487_v18, %v481_v16 }
 0x5fd   : > { %v486_v21 = vpop.permute.xlu1 %485 }
 0x5fe   : > { %v491_v9 = vmul.f32 0.01, %v489_v19  ;;  %v488_v57 = vsub.f32 %v486_v21, %v1223_v30 }
 0x600   : > { %v493_v28 = vsub.f32 %v1194_v15, %v491_v9  ;;  %v490_v54 = vadd.f32 %v488_v57, %v482_v23  ;;  %v549_v23 = vmul.f32 -0.99, %v1218_v25 }
 0x602   : > { %v495_v31 = vmul.f32 0.990099, %v493_v28  ;;  %v492_v59 = vmul.f32 0.01, %v490_v54 }
 0x604   : > { %v497_v32 = vadd.f32 %v495_v31, %v947_v29  ;;  %v494_v34 = vsub.f32 %v1200_v22, %v492_v59  ;;  %v550_v31 = vmul.f32 -0.99, %v1223_v30 }
 0x606   : > { %v537_v12 = vsub.f32 %v497_v32, %v1194_v15  ;;  %v496_v0 = vmul.f32 0.990099, %v494_v34  ;;  %v499_v62 = vmul.f32 2.0, %v497_v32 }
 0x608   : > { %v539_v39 = vmul.f32 1.99, %v537_v12  ;;  %v498_v40 = vadd.f32 %v496_v0, %v955_v37  ;;  %v501_v1 = vsub.f32 %v499_v62, %v1194_v15  ;;  %v544_v12 = vmul.f32 -0.99, %v1228_v35 }
 0x60a   : > { %v1250_v43 = vadd.f32 %v539_v39, %v1194_v15  ;;  %v538_v14 = vsub.f32 %v498_v40, %v1200_v22  ;;  %513 = vrot.lane.b32.xlu0 %v501_v1, %s882_s24  ;;  %v500_v5 = vmul.f32 2.0, %v498_v40  ;;  %v503_v17 = vrot.slane %v501_v1, 1 }
 0x60c   : > { %v540_v13 = vmul.f32 1.99, %v538_v14  ;;  %v502_v46 = vsub.f32 %v500_v5, %v1200_v22 }
 0x60e   : > { %v1256_v47 = vadd.f32 %v540_v13, %v1200_v22  ;;  %515 = vrot.lane.b32.xlu1 %v502_v46, %s882_s24  ;;  %v504_v36 = vrot.slane %v502_v46, 1 }
 0x610   : > { %v505_v49 = vsel %vm113_vm3, %v503_v17, %v504_v36  ;;  %v506_v51 = vsel %vm113_vm3, %v504_v36, %v503_v17 }
 0x611   : > { %v507_v15 = vsub.f32 %v505_v49, %v501_v1  ;;  %v508_v20 = vsub.f32 %v506_v51, %v502_v46 }
 0x613   : > { %v509_v52 = vmul.f32 %v507_v15, %v972_v50  ;;  %v510_v58 = vmul.f32 %v508_v20, %v977_v55 }
 0x615   : > { %v511_v24 = vadd.f32 %v509_v52, %v1231_v42  ;;  %v512_v2 = vadd.f32 %v510_v58, %v1228_v35 }
 0x617   : > { %v523_v26 = vmul.f32 %v511_v24, %v511_v24  ;;  %v524_v44 = vmul.f32 %v512_v2, %v512_v2 }
 0x67c   : > { %v514_v56 = vpop.permute.xlu0 %513 }
 0x67d   : > { %v517_v41 = vsub.f32 %v514_v56, %v501_v1 }
 0x67f   : > { %v519_v22 = vmul.f32 %v517_v41, %v975_v53 }
 0x680   : > { %v516_v61 = vpop.permute.xlu1 %515 }
 0x681   : > { %v521_v27 = vadd.f32 %v519_v22, %v1218_v25  ;;  %v518_v63 = vsub.f32 %v516_v61, %v502_v46  ;;  %v543_v25 = vmul.f32 -0.99, %v1231_v42 }
 0x683   : > { %v525_v11 = vmul.f32 %v521_v27, %v521_v27  ;;  %v520_v4 = vmul.f32 %v518_v63, %v982_v60 }
 0x685   : > { %v527_v6 = vadd.f32 %v525_v11, %v523_v26  ;;  %v522_v7 = vadd.f32 %v520_v4, %v1223_v30 }
 0x687   : > { %804 = vrsqrt.f32 %v527_v6  ;;  %v526_v8 = vmul.f32 %v522_v7, %v522_v7 }
 0x689   : > { %v528_v33 = vadd.f32 %v526_v8, %v524_v44 }
 0x68b   : > { %806 = vrsqrt.f32 %v528_v33 }
 0x691   : > { %v805_v45 = vpop.eup %804 }
 0x692   : > { %v531_v38 = vmul.f32 %v805_v45, %v991_v10 }
 0x694   : > { %v533_v16 = vmin.f32 %v531_v38, 1.0 }
 0x695   : > { %v807_v18 = vpop.eup %806 }
 0x696   : > { %v535_v48 = vmul.f32 1.99, %v533_v16  ;;  %v532_v19 = vmul.f32 %v807_v18, %v991_v10 }
 0x698   : > { %v551_v21 = vmul.f32 %v535_v48, %v521_v27  ;;  %v534_v9 = vmin.f32 %v532_v19, 1.0  ;;  %v545_v34 = vmul.f32 %v535_v48, %v511_v24 }
 0x69a   : > { %v536_v57 = vmul.f32 1.99, %v534_v9  ;;  %v1274_v28 = vadd.f32 %v551_v21, %v549_v23  ;;  %v1287_v62 = vadd.f32 %v545_v34, %v543_v25 }
 0x69c   : > { %v552_v54 = vmul.f32 %v536_v57, %v522_v7  ;;  %561 = vrot.lane.b32.xlu0 %v1274_v28, %s881_s23  ;;  %v546_v32 = vmul.f32 %v536_v57, %v512_v2  ;;  %v555_v40 = vrot.slane %v1287_v62, 7 }
 0x69e   : > { %v1279_v59 = vadd.f32 %v552_v54, %v550_v31  ;;  %v1284_v0 = vadd.f32 %v546_v32, %v544_v12 }
 0x6a0   : > { %563 = vrot.lane.b32.xlu1 %v1279_v59, %s881_s23  ;;  %v556_v39 = vrot.slane %v1284_v0, 7 }
 0x6a2   : > { %v558_v30 = vsel %vm86_vm2, %v556_v39, %v555_v40  ;;  %v557_v35 = vsel %vm86_vm2, %v555_v40, %v556_v39 }
 0x6a3   : > { %v559_v14 = vsub.f32 %v558_v30, %v1287_v62  ;;  %v560_v36 = vsub.f32 %v557_v35, %v1284_v0 }
 0x70e   : > { %v562_v1 = vpop.permute.xlu0 %561 }
 0x70f   : > { %v565_v5 = vsub.f32 %v562_v1, %v1274_v28 }
 0x711   : > { %v567_v13 = vadd.f32 %v565_v5, %v559_v14 }
 0x712   : > { %v564_v46 = vpop.permute.xlu1 %563 }
 0x713   : > { %v569_v42 = vmul.f32 0.01, %v567_v13  ;;  %v566_v17 = vsub.f32 %v564_v46, %v1279_v59 }
 0x715   : > { %v571_v49 = vsub.f32 %v1250_v43, %v569_v42  ;;  %v568_v15 = vadd.f32 %v566_v17, %v560_v36  ;;  %v628_v36 = vmul.f32 -0.99, %v1279_v59 }
 0x717   : > { %v573_v51 = vmul.f32 0.990099, %v571_v49  ;;  %v570_v20 = vmul.f32 0.01, %v568_v15 }
 0x719   : > { %v575_v52 = vadd.f32 %v573_v51, %v947_v29  ;;  %v572_v56 = vsub.f32 %v1256_v47, %v570_v20  ;;  %v622_v51 = vmul.f32 -0.99, %v1284_v0 }
 0x71b   : > { %v615_v41 = vsub.f32 %v575_v52, %v1250_v43  ;;  %v574_v24 = vmul.f32 0.990099, %v572_v56  ;;  %v577_v22 = vmul.f32 2.0, %v575_v52 }
 0x71d   : > { %v617_v58 = vmul.f32 1.99, %v615_v41  ;;  %v576_v61 = vadd.f32 %v574_v24, %v955_v37  ;;  %v579_v27 = vsub.f32 %v577_v22, %v1250_v43 }
 0x71f   : > { %v1306_v63 = vadd.f32 %v617_v58, %v1250_v43  ;;  %v616_v26 = vsub.f32 %v576_v61, %v1256_v47  ;;  %591 = vrot.lane.b32.xlu0 %v579_v27, %s882_s24  ;;  %v578_v11 = vmul.f32 2.0, %v576_v61  ;;  %v581_v44 = vrot.slane %v579_v27, 1 }
 0x721   : > { %v618_v2 = vmul.f32 1.99, %v616_v26  ;;  %v580_v4 = vsub.f32 %v578_v11, %v1256_v47 }
 0x723   : > { %v1312_v6 = vadd.f32 %v618_v2, %v1256_v47  ;;  %593 = vrot.lane.b32.xlu1 %v580_v4, %s882_s24  ;;  %v582_v7 = vrot.slane %v580_v4, 1 }
 0x725   : > { %v583_v8 = vsel %vm113_vm3, %v581_v44, %v582_v7  ;;  %v584_v33 = vsel %vm113_vm3, %v582_v7, %v581_v44 }
 0x726   : > { %v585_v43 = vsub.f32 %v583_v8, %v579_v27  ;;  %v586_v45 = vsub.f32 %v584_v33, %v580_v4 }
 0x728   : > { %v587_v38 = vmul.f32 %v585_v43, %v972_v50  ;;  %v588_v19 = vmul.f32 %v586_v45, %v977_v55 }
 0x72a   : > { %v589_v48 = vadd.f32 %v587_v38, %v1287_v62  ;;  %v590_v31 = vadd.f32 %v588_v19, %v1284_v0 }
 0x72c   : > { %v601_v57 = vmul.f32 %v589_v48, %v589_v48  ;;  %v602_v12 = vmul.f32 %v590_v31, %v590_v31 }
 0x791   : > { %v592_v16 = vpop.permute.xlu0 %591 }
 0x792   : > { %v595_v18 = vsub.f32 %v592_v16, %v579_v27 }
 0x794   : > { %v597_v47 = vmul.f32 %v595_v18, %v975_v53 }
 0x795   : > { %v594_v21 = vpop.permute.xlu1 %593 }
 0x796   : > { %v599_v9 = vadd.f32 %v597_v47, %v1274_v28  ;;  %v596_v23 = vsub.f32 %v594_v21, %v580_v4 }
 0x798   : > { %v603_v54 = vmul.f32 %v599_v9, %v599_v9  ;;  %v598_v32 = vmul.f32 %v596_v23, %v982_v60  ;;  %v627_v60 = vmul.f32 -0.99, %v1274_v28  ;;  %v621_v28 = vmul.f32 -0.99, %v1287_v62 }
 0x79a   : > { %v605_v34 = vadd.f32 %v603_v54, %v601_v57  ;;  %v600_v50 = vadd.f32 %v598_v32, %v1279_v59 }
 0x79c   : > { %808 = vrsqrt.f32 %v605_v34  ;;  %v604_v25 = vmul.f32 %v600_v50, %v600_v50 }
 0x79e   : > { %v606_v39 = vadd.f32 %v604_v25, %v602_v12 }
 0x7a0   : > { %810 = vrsqrt.f32 %v606_v39 }
 0x7a6   : > { %v809_v53 = vpop.eup %808 }
 0x7a7   : > { %v609_v55 = vmul.f32 %v809_v53, %v991_v10 }
 0x7a9   : > { %v611_v40 = vmin.f32 %v609_v55, 1.0 }
 0x7aa   : > { %v811_v30 = vpop.eup %810 }
 0x7ab   : > { %v613_v1 = vmul.f32 1.99, %v611_v40  ;;  %v610_v14 = vmul.f32 %v811_v30, %v991_v10 }
 0x7ad   : > { %v629_v5 = vmul.f32 %v613_v1, %v599_v9  ;;  %v612_v35 = vmin.f32 %v610_v14, 1.0  ;;  %v623_v15 = vmul.f32 %v613_v1, %v589_v48 }
 0x7af   : > { %v614_v13 = vmul.f32 1.99, %v612_v35  ;;  %v1330_v46 = vadd.f32 %v629_v5, %v627_v60  ;;  %v1343_v52 = vadd.f32 %v623_v15, %v621_v28  ;;  %v816_v35 = vld [vmem:[#allocation4] sm:$0xff] }
 0x7b1   : > { %v630_v42 = vmul.f32 %v614_v13, %v600_v50  ;;  %639 = vrot.lane.b32.xlu0 %v1330_v46, %s881_s23  ;;  %v624_v49 = vmul.f32 %v614_v13, %v590_v31  ;;  %v633_v41 = vrot.slane %v1343_v52, 7 }
 0x7b3   : > { %v1335_v17 = vadd.f32 %v630_v42, %v628_v36  ;;  %v1340_v20 = vadd.f32 %v624_v49, %v622_v51  ;;  %v817_v49 = vld [vmem:[#allocation5] sm:$0xff]  ;;  %v818_v51 = vld [vmem:[#allocation4 + $0x8] sm:$0xff] }
 0x7b5   : > { %641 = vrot.lane.b32.xlu1 %v1335_v17, %s881_s23  ;;  %v634_v56 = vrot.slane %v1340_v20, 7 }
 0x7b7   : > { %v636_v59 = vsel %vm86_vm2, %v634_v56, %v633_v41  ;;  %v635_v0 = vsel %vm86_vm2, %v633_v41, %v634_v56 }
 0x7b8   : > { %v637_v22 = vsub.f32 %v636_v59, %v1343_v52  ;;  %v638_v26 = vsub.f32 %v635_v0, %v1340_v20  ;;  %v819_v0 = vld [vmem:[#allocation5 + $0x8] sm:$0xff] }
 0x823   : > { %v640_v24 = vpop.permute.xlu0 %639 }
 0x824   : > { %v643_v58 = vsub.f32 %v640_v24, %v1330_v46 }
 0x826   : > { %v645_v61 = vadd.f32 %v643_v58, %v637_v22 }
 0x827   : > { %v642_v27 = vpop.permute.xlu1 %641 }
 0x828   : > { %v647_v62 = vmul.f32 0.01, %v645_v61  ;;  %v644_v11 = vsub.f32 %v642_v27, %v1335_v17 }
 0x82a   : > { %v649_v2 = vsub.f32 %v1306_v63, %v647_v62  ;;  %v646_v4 = vadd.f32 %v644_v11, %v638_v26 }
 0x82c   : > { %v651_v7 = vmul.f32 0.990099, %v649_v2  ;;  %v648_v44 = vmul.f32 0.01, %v646_v4 }
 0x82e   : > { %v653_v8 = vadd.f32 %v651_v7, %v947_v29  ;;  %v650_v43 = vsub.f32 %v1312_v6, %v648_v44 }
 0x830   : > { %v693_v33 = vsub.f32 %v653_v8, %v1306_v63  ;;  %v652_v45 = vmul.f32 0.990099, %v650_v43  ;;  %v655_v38 = vmul.f32 2.0, %v653_v8 }
 0x832   : > { %v695_v16 = vmul.f32 1.99, %v693_v33  ;;  %v654_v18 = vadd.f32 %v652_v45, %v955_v37  ;;  %v657_v48 = vsub.f32 %v655_v38, %v1306_v63  ;;  %v699_v45 = vmul.f32 -0.99, %v1343_v52 }
 0x833   : > { %v705_v38 = vmul.f32 -0.99, %v1330_v46 }
 0x834   : > { %v694_v47 = vsub.f32 %v654_v18, %v1312_v6  ;;  %669 = vrot.lane.b32.xlu1 %v657_v48, %s882_s24  ;;  %v656_v19 = vmul.f32 2.0, %v654_v18  ;;  %v697_v21 = vadd.f32 %v695_v16, %v1306_v63  ;;  %v659_v1 = vrot.slane %v657_v48, 1 }
 0x836   : > { %v696_v9 = vmul.f32 1.99, %v694_v47  ;;  %v658_v29 = vsub.f32 %v656_v19, %v1312_v6  ;;  %711 = vst [vmem:[#allocation11] sm:$0xff] %v697_v21  ;;  %v719_v23 = vadd.f32 1e-12, %v697_v21  ;;  %v717_v54 = vsub.f32 %v1306_v63, %v697_v21 }
 0x838   : > { %671 = vrot.lane.b32.xlu1 %v658_v29, %s882_s24  ;;  %v698_v57 = vadd.f32 %v696_v9, %v1312_v6  ;;  %v723_v37 = vmul.f32 %v719_v23, %v719_v23  ;;  %v721_v12 = vmul.f32 %v717_v54, %v717_v54  ;;  %v660_v30 = vrot.slane %v658_v29, 1 }
 0x839   : > { %v700_v9 = vmul.f32 -0.99, %v1340_v20 }
 0x83a   : > { %v718_v31 = vsub.f32 %v1312_v6, %v698_v57  ;;  %v720_v32 = vadd.f32 1e-12, %v698_v57  ;;  %712 = vst [vmem:[#allocation11 + $0x8] sm:$0xff] %v698_v57  ;;  %v725_v50 = vmul.f32 1e-10, %v723_v37  ;;  %v661_v14 = vsel %vm113_vm3, %v659_v1, %v660_v30 }
 0x83b   : > { %v663_v63 = vsub.f32 %v661_v14, %v657_v48  ;;  %v662_v6 = vsel %vm113_vm3, %v660_v30, %v659_v1 }
 0x83c   : > { %v724_v34 = vmul.f32 %v720_v32, %v720_v32  ;;  %v722_v25 = vmul.f32 %v718_v31, %v718_v31  ;;  %v727_v53 = vsub.f32 %v721_v12, %v725_v50  ;;  %v664_v5 = vsub.f32 %v662_v6, %v658_v29 }
 0x83d   : > { %v665_v60 = vmul.f32 %v816_v35, %v663_v63 }
 0x83e   : > { %v726_v39 = vmul.f32 1e-10, %v724_v34  ;;  %v666_v28 = vmul.f32 %v818_v51, %v664_v5 }
 0x83f   : > { %v667_v36 = vadd.f32 %v665_v60, %v1343_v52 }
 0x840   : > { %v728_v55 = vsub.f32 %v722_v25, %v726_v39  ;;  %v668_v58 = vadd.f32 %v666_v28, %v1340_v20 }
 0x841   : > { %v679_v24 = vmul.f32 %v667_v36, %v667_v36 }
 0x842   : > { %v729_v40 = vadd.f32 %v728_v55, %v727_v53  ;;  %v680_v26 = vmul.f32 %v668_v58, %v668_v58 }
 0x844   : > { %730 = vadd.xlane.f32.xlu0 %v729_v40 }
 0x8a6   : > { %v670_v13 = vpop.permute.xlu1 %669 }
 0x8a7   : > { %v673_v42 = vsub.f32 %v670_v13, %v657_v48 }
 0x8a9   : > { %v675_v15 = vmul.f32 %v817_v49, %v673_v42 }
 0x8aa   : > { %v672_v56 = vpop.permute.xlu1 %671 }
 0x8ab   : > { %v677_v41 = vadd.f32 %v675_v15, %v1330_v46  ;;  %v674_v59 = vsub.f32 %v672_v56, %v658_v29  ;;  %v706_v29 = vmul.f32 -0.99, %v1335_v17 }
 0x8ad   : > { %v681_v22 = vmul.f32 %v677_v41, %v677_v41  ;;  %v676_v61 = vmul.f32 %v819_v0, %v674_v59 }
 0x8af   : > { %v683_v27 = vadd.f32 %v681_v22, %v679_v24  ;;  %v678_v62 = vadd.f32 %v676_v61, %v1335_v17 }
 0x8b1   : > { %812 = vrsqrt.f32 %v683_v27  ;;  %v682_v11 = vmul.f32 %v678_v62, %v678_v62 }
 0x8b3   : > { %v684_v2 = vadd.f32 %v682_v11, %v680_v26 }
 0x8b5   : > { %814 = vrsqrt.f32 %v684_v2 }
 0x8bb   : > { %v813_v4 = vpop.eup %812 }
 0x8bc   : > { %v687_v7 = vmul.f32 %v813_v4, %v991_v10 }
 0x8be   : > { %v689_v44 = vmin.f32 %v687_v7, 1.0 }
 0x8bf   : > { %v815_v8 = vpop.eup %814 }
 0x8c0   : > { %v691_v43 = vmul.f32 1.99, %v689_v44  ;;  %v688_v33 = vmul.f32 %v815_v8, %v991_v10 }
 0x8c2   : > { %v701_v16 = vmul.f32 %v691_v43, %v667_v36  ;;  %v707_v18 = vmul.f32 %v691_v43, %v677_v41  ;;  %v690_v48 = vmin.f32 %v688_v33, 1.0 }
 0x8c4   : > { %v703_v47 = vadd.f32 %v701_v16, %v699_v45  ;;  %v709_v19 = vadd.f32 %v707_v18, %v705_v38  ;;  %v692_v21 = vmul.f32 1.99, %v690_v48 }
 0x8c6   : > { %713 = vst [vmem:[#allocation2] sm:$0xff] %v703_v47  ;;  %715 = vst [vmem:[#allocation3] sm:$0xff] %v709_v19  ;;  %v702_v23 = vmul.f32 %v692_v21, %v668_v58  ;;  %v708_v57 = vmul.f32 %v692_v21, %v678_v62 }
 0x8c8   : > { %v704_v37 = vadd.f32 %v702_v23, %v700_v9  ;;  %v710_v10 = vadd.f32 %v708_v57, %v706_v29 }
 0x8ca   : > { %714 = vst [vmem:[#allocation2 + $0x8] sm:$0xff] %v704_v37  ;;  %716 = vst [vmem:[#allocation3 + $0x8] sm:$0xff] %v710_v10 }
 0x8d1   : > { %v731_v52 = vpop.xlane.xlu0 %730 }
 0x8d2   : > { %v732_v46 = vrot.slane %v731_v52, 4 }
 0x8d4   : > { %v733_v54 = vadd.f32 %v732_v46, %v731_v52 }
 0x8d6   : > { %v734_v31 = vrot.slane %v733_v54, 2 }
 0x8d8   : > { %v735_v32 = vadd.f32 %v734_v31, %v733_v54 }
 0x8da   : > { %v736_v34 = vrot.slane %v735_v32, 1 }
 0x8dc   : > { %v737_v50 = vadd.f32 %v736_v34, %v735_v32 }
 0x8de   : > { %766 = vpush %v737_v50 }
 0x90f   : > { %s767_s28 = spop %766 }
 0x910   : > { %p739_p8 = scmp.lt.f32.partialorder %s767_s28, 0.0 }
 0x912   : > { %p65_p10 = pneg %p739_p8 }
 0x914   : > { %p66_p11 = pnand %p65_p10, %p64_p9 }
 0x915   :  { %s883_s29 = smov (%p66_p11), [#allocation11]  }
 0x916   :  { %69 = sbr.rel (!%p66_p11) target bundleno = 29 (0x1d), region = 35  ;;  %s746_s30 = sshll.u32 (%p66_p11), %s883_s29, 4  ;;  %s747_s30 = int_to_ptr.vmem [resolvable:$true] %s746_s30 }
 0x917   :  { %s842_s3 = scalar_lea.vmem (%p66_p11), %s747_s30, 256  ;;  %p847_p13 = scmp.lt.s32.totalorder (%p66_p11), %s747_s30, %s747_s30 }
 0x918   :  { %p843_p12 = scmp.ne.s32.totalorder (%p66_p11), %s747_s30, %s842_s3  ;;  %p848_p0 = scmp.lt.s32.totalorder (%p66_p11), %s842_s3, %s842_s3 }
 0x91a   :  { %p849_p1 = por (%p66_p11), %p848_p0, %p847_p13 }
 0x91c   :  { %p850_p2 = pnand (%p66_p11), %p849_p1, %p843_p12 }
 0x91e   :  { %853 = shalt.err (!%p850_p2)
}
 0x91f   :  { %s854_s6 = scalar_lea.hbm %s1407_s2, 256 }
 0x920   :  { %p855_p3 = scmp.ne.s32.totalorder %s1407_s2, %s854_s6  ;;  %p858_p4 = scmp.lt.u32.totalorder %s854_s6, %s1407_s2 }
 0x922   :  { %p860_p5 = pnand %p858_p4, %p855_p3 }
 0x924   :  { %863 = shalt.err (!%p860_p5)
}
 0x925   :  { %752 = dma.vmem_to_hbm [thread:$0]  %s747_s30, 256, %s1407_s2, [#allocation10], %s877_s19, %s877_s19, %s878_s20  }
 0x926   :  { %870 = dma.done.wait [#allocation10], 256  }
 0x927   :  { %871 = vsyncadd [#allocation10], 4294967040 }
 0x928   :  { %756 = vsyncpa [#allocation9], 1 }
 0x929   :  { %757 = vsyncpa [#allocation10], 1 }

</bundles_post_ra>
